<compile_context>
chip_gen: v7x
topology: tpu7x:2x2x1
jax: 0.10.0
libtpu: 0.0.40
codegen_flags: <defaults>
</compile_context>

<pallas_src>
import jax
import jax.numpy as jnp
from jax.experimental import pallas as pl
from jax.experimental.pallas import tpu as pltpu
import numpy as np

INPUT_SIZE = 16
HIDDEN = 64
NUM_LAYERS = 2  # forward() in the reference assumes exactly 2 layers


def _lstm_kernel(x2d_ref,              # (T*B, I)   time-major, flattened
                 wih0_ref,             # (I, 4H)    layer-0 input weights  (g-cols x2)
                 whh0_ref,             # (H, 4H)    layer-0 recurrent wts  (g-cols x2)
                 b0_ref,               # (1, 4H)    layer-0 bias b_ih+b_hh (g-cols x2)
                 w1_ref,               # (2H, 4H)   layer-1 fused [W_ih1; W_hh1] (g-cols x2)
                 b1_ref,               # (1, 4H)    layer-1 bias b_ih+b_hh (g-cols x2)
                 wfc_ref,              # (1, H)     fc weight (row layout)
                 bfc_ref,              # (1, 1)     fc bias
                 out_ref,              # (B, 1)     output
                 h12_ref):             # (B, 2H)    persistent fused layer-1 input
    B = out_ref.shape[0]
    TB = x2d_ref.shape[0]
    T = TB // B
    H = whh0_ref.shape[0]
    H4 = 4 * H

    # --- Hoisted layer-0 input projection (bias folded in): one MXU pass,
    # kept as a value (no VMEM scratch round-trip), off the recurrent chain.
    xproj = (jnp.dot(x2d_ref[...], wih0_ref[...],
                     preferred_element_type=jnp.float32) + b0_ref[...])

    # Pre-broadcast layer-1 bias once (JAX does not CSE broadcast_in_dim).
    b1b = jnp.broadcast_to(b1_ref[...], (B, H4))

    def cell(gates, c):
        # sigmoid(x) == 0.5 * tanh(0.5 * x) + 0.5.  The g-gate weight/bias
        # columns were pre-scaled by 2 in prepare_params(), so ONE full-width
        # tanh(0.5 * gates) pass gives sigmoid for the i/f/o lanes and tanh for
        # the g lanes (1 EUP op per cell instead of chained exp + reciprocal).
        th = jnp.tanh(0.5 * gates)                       # (B, 4H)
        i = 0.5 * th[:, 0 * H:1 * H] + 0.5
        f = 0.5 * th[:, 1 * H:2 * H] + 0.5
        g = th[:, 2 * H:3 * H]
        o = 0.5 * th[:, 3 * H:4 * H] + 0.5
        c_new = f * c + i * g
        h_new = o * jnp.tanh(c_new)
        return h_new, c_new

    zeros = jnp.zeros((B, H), jnp.float32)
    c1, c2 = zeros, zeros

    # ---- t = 0 (peeled): h1, h2, c1, c2 are all zero, so both recurrent
    # matmuls drop out and layer-1 only needs the W_ih1 half of w1.
    h1, c1 = cell(xproj[0:B, :], c1)                     # no h1 @ W_hh0
    h12_ref[:, 0:H] = h1
    gates1 = jnp.dot(h1, w1_ref[0:H, :],                 # only W_ih1 rows
                     preferred_element_type=jnp.float32) + b1b
    h2, c2 = cell(gates1, c2)
    h12_ref[:, H:2 * H] = h2

    # ---- t = 1 .. T-1, fully unrolled (static slices; layer-1(t) and
    # layer-0(t+1) are independent so the scheduler can overlap their MXU/EUP
    # work).
    # Note (perf review, v5e/v6e): holding whh0/w1 resident in the MXU staging
    # registers across the unrolled loop (pltpu.matmul_push_rhs once, then
    # matmul_acc_lhs/matmul_pop per step) would remove the repeated RHS
    # streaming; verify in a bundle dump that Mosaic isn't already hoisting the
    # pushes before hand-driving the MXU.
    for t in range(1, T):
        # layer 0: recurrent matmul only; x-projection already hoisted.
        gates0 = xproj[t * B:(t + 1) * B, :] + jnp.dot(
            h1, whh0_ref[...], preferred_element_type=jnp.float32)
        h1, c1 = cell(gates0, c1)
        h12_ref[:, 0:H] = h1                              # layer-0 half

        # layer 1: single fused K=2H matmul on the persistent [h1 | h2] buffer
        # (no per-step concatenate).
        gates1 = jnp.dot(h12_ref[...], w1_ref[...],
                         preferred_element_type=jnp.float32) + b1b
        h2, c2 = cell(gates1, c2)
        if t < T - 1:
            h12_ref[:, H:2 * H] = h2                      # layer-1 half

    # fc(H -> 1) as VPU multiply + lane reduction (avoid an N=1 MXU drain),
    # then sigmoid.
    logits = jnp.sum(h2 * wfc_ref[...], axis=-1, keepdims=True) + bfc_ref[...]
    out_ref[...] = jax.nn.sigmoid(logits)


def prepare_params(params):
    """One-time weight preparation (run at model load, NOT per forward call):
       * fuse layer-1 [W_ih1; W_hh1] along K into one (2H, 4H) matrix,
       * pre-scale the cell-gate (g) weight/bias columns by 2 so the kernel can
         use the single-tanh sigmoid identity full-width,
       * lay the fc weight out as a (1, H) row for the in-kernel VPU reduce.
    """
    H = params["whh0"].shape[0]

    def scale_g(w):
        return w.at[..., 2 * H:3 * H].multiply(2.0)

    w1 = jnp.concatenate([params["wih1"], params["whh1"]], axis=0)   # (2H, 4H)
    return {
        "wih0": scale_g(params["wih0"]),
        "whh0": scale_g(params["whh0"]),
        "b0":   scale_g(params["b0"]),
        "w1":   scale_g(w1),
        "b1":   scale_g(params["b1"]),
        "wfc_row": jnp.transpose(params["wfc"]),                     # (1, H)
        "bfc":  params["bfc"],
    }


def lstm_network_forward(x_btI, prep):
    """x_btI: (B, T, I) float32 (PyTorch batch_first layout). Returns (B, 1)."""
    B, T, I = x_btI.shape
    H = prep["whh0"].shape[0]
    H4 = 4 * H

    # time-major + flatten so the layer-0 input projection is one MXU pass.
    # (Negligible at B=2; at large batch fuse this transpose into the producer
    # or feed (B, T, I) through a batch-tiled BlockSpec instead.)
    x_tbi_flat = jnp.transpose(x_btI, (1, 0, 2)).reshape(T * B, I)

    # Advisory cost so XLA schedules around the call.
    flops = (2 * T * B * I * H4                 # hoisted input projection
             + (T - 1) * 2 * B * H * H4         # layer-0 recurrent matmuls
             + 2 * B * H * H4                   # layer-1 t=0 (W_ih1 only)
             + (T - 1) * 2 * B * (2 * H) * H4   # layer-1 fused K=2H matmuls
             + 2 * B * H)                       # fc
    transcendentals = T * 2 * B * (H4 + H) + B
    bytes_accessed = 4 * (T * B * I + I * H4 + H * H4 + H4
                          + 2 * H * H4 + H4 + H + 1 + B)

    vmem = pl.BlockSpec(memory_space=pltpu.MemorySpace.VMEM)
    # Scaling notes (perf review): once B grows, switch to a 1-D grid over
    # batch tiles (multiple-of-8 B_TILE, weights with constant index_maps,
    # dimension_semantics=("parallel",) so both v7x TensorCores work) and keep
    # the tile within scoped VMEM (v7x has 64 MiB vs 128 MiB on v5e/v6e).  For
    # throughput-bound batches, cast matmul operands to bf16 (weights once
    # here, h per step) with preferred_element_type=f32.  If called per-step in
    # a decode loop, prefetch the ~0.3 MiB of weights cross-call (P10).
    out = pl.pallas_call(
        _lstm_kernel,
        out_shape=jax.ShapeDtypeStruct((B, 1), jnp.float32),
        in_specs=[vmem] * 8,
        out_specs=vmem,
        scratch_shapes=[pltpu.VMEM((B, 2 * H), jnp.float32)],
        cost_estimate=pl.CostEstimate(flops=flops,
                                      transcendentals=transcendentals,
                                      bytes_accessed=bytes_accessed),
    )(x_tbi_flat,
      prep["wih0"], prep["whh0"], prep["b0"],
      prep["w1"], prep["b1"],
      prep["wfc_row"], prep["bfc"])
    return out


def init_params(key, input_size=INPUT_SIZE, hidden=HIDDEN):
    """Deterministic init matching PyTorch shapes (stored pre-transposed)."""
    ks = jax.random.split(key, 10)
    s = 1.0 / np.sqrt(hidden)
    u = lambda k, shape: jax.random.uniform(k, shape, jnp.float32, -s, s)
    params = {
        # layer 0: W_ih (4H, I) -> (I, 4H), W_hh (4H, H) -> (H, 4H)
        "wih0": u(ks[0], (input_size, 4 * hidden)),
        "whh0": u(ks[1], (hidden, 4 * hidden)),
        "b0":   (u(ks[2], (1, 4 * hidden)) + u(ks[3], (1, 4 * hidden))),  # b_ih + b_hh
        # layer 1: input is layer-0 hidden state
        "wih1": u(ks[4], (hidden, 4 * hidden)),
        "whh1": u(ks[5], (hidden, 4 * hidden)),
        "b1":   (u(ks[6], (1, 4 * hidden)) + u(ks[7], (1, 4 * hidden))),
        # fc: (1, H) -> (H, 1)
        "wfc":  u(ks[8], (hidden, 1)),
        "bfc":  u(ks[9], (1, 1)),
    }
    return params


def _reference_forward(x_btI, params):
    """Pure-JAX reference of the PyTorch forward, for correctness check."""
    B, T, I = x_btI.shape
    H = HIDDEN

    def cell(x_t, h, c, wih, whh, b):
        g = x_t @ wih + h @ whh + b
        i = jax.nn.sigmoid(g[:, 0 * H:1 * H])
        f = jax.nn.sigmoid(g[:, 1 * H:2 * H])
        gg = jnp.tanh(g[:, 2 * H:3 * H])
        o = jax.nn.sigmoid(g[:, 3 * H:4 * H])
        c = f * c + i * gg
        h = o * jnp.tanh(c)
        return h, c

    h1 = c1 = h2 = c2 = jnp.zeros((B, H), jnp.float32)
    for t in range(T):
        x_t = x_btI[:, t, :]
        h1, c1 = cell(x_t, h1, c1, params["wih0"], params["whh0"], params["b0"])
        h2, c2 = cell(h1, h2, c2, params["wih1"], params["whh1"], params["b1"])
    return jax.nn.sigmoid(h2 @ params["wfc"] + params["bfc"])


if __name__ == "__main__":
    key = jax.random.PRNGKey(0)
    k_x, k_p = jax.random.split(key)

    B, T, I = 2, 8, INPUT_SIZE
    x = jax.random.normal(k_x, (B, T, I), jnp.float32)   # PyTorch-style (B, T, I)
    params = init_params(k_p)
    prep = prepare_params(params)                        # one-time weight prep

    out = lstm_network_forward(x, prep)
    out = jax.block_until_ready(out)

    ref = _reference_forward(x, params)
    assert out.shape == (B, 1)
    np.testing.assert_allclose(np.asarray(out), np.asarray(ref), rtol=1e-5, atol=1e-5)

    print("KERNEL_OK")
</pallas_src>

<mosaic_0001>
module attributes {stable_mosaic.version = 11 : i64} {
  func.func @_lstm_kernel(%arg0: memref<16x16xf32, #tpu.memory_space<vmem>>, %arg1: memref<16x256xf32, #tpu.memory_space<vmem>>, %arg2: memref<64x256xf32, #tpu.memory_space<vmem>>, %arg3: memref<1x256xf32, #tpu.memory_space<vmem>>, %arg4: memref<128x256xf32, #tpu.memory_space<vmem>>, %arg5: memref<1x256xf32, #tpu.memory_space<vmem>>, %arg6: memref<1x64xf32, #tpu.memory_space<vmem>>, %arg7: memref<1x1xf32, #tpu.memory_space<vmem>>, %arg8: memref<2x1xf32, #tpu.memory_space<vmem>>, %arg9: memref<2x128xf32, #tpu.memory_space<vmem>>) attributes {dimension_semantics = [], scalar_prefetch = 0 : i64, scratch_operands = 1 : i64, tpu.core_type = #tpu.core_type<tc>} {
    %c0 = arith.constant 0 : index
    %c0_0 = arith.constant 0 : index
    %0 = vector.load %arg0[%c0, %c0_0] : memref<16x16xf32, #tpu.memory_space<vmem>>, vector<16x16xf32>
    %c0_1 = arith.constant 0 : index
    %c0_2 = arith.constant 0 : index
    %1 = vector.load %arg1[%c0_1, %c0_2] : memref<16x256xf32, #tpu.memory_space<vmem>>, vector<16x256xf32>
    %cst = arith.constant dense<0.000000e+00> : vector<16x256xf32>
    %2 = tpu.matmul %0, %1, %cst {dimension_numbers = #tpu.dot_dimension_numbers<[1], [0], [0], [1], [0, 0, 1, 1], [], []>} : vector<16x16xf32>, vector<16x256xf32>, vector<16x256xf32> -> vector<16x256xf32>
    %c0_3 = arith.constant 0 : index
    %c0_4 = arith.constant 0 : index
    %3 = vector.load %arg3[%c0_3, %c0_4] : memref<1x256xf32, #tpu.memory_space<vmem>>, vector<1x256xf32>
    %4 = vector.broadcast %3 : vector<1x256xf32> to vector<16x256xf32>
    %5 = arith.addf %2, %4 : vector<16x256xf32>
    %c0_5 = arith.constant 0 : index
    %c0_6 = arith.constant 0 : index
    %6 = vector.load %arg5[%c0_5, %c0_6] : memref<1x256xf32, #tpu.memory_space<vmem>>, vector<1x256xf32>
    %7 = vector.shape_cast %6 : vector<1x256xf32> to vector<1x256xf32>
    %8 = vector.broadcast %7 : vector<1x256xf32> to vector<2x256xf32>
    %cst_7 = arith.constant 0.000000e+00 : f32
    %9 = vector.broadcast %cst_7 : f32 to vector<2x64xf32>
    %10 = vector.extract_strided_slice %5 {offsets = [0, 0], sizes = [2, 256], strides = [1, 1]} : vector<16x256xf32> to vector<2x256xf32>
    %cst_8 = arith.constant 5.000000e-01 : f32
    %11 = vector.broadcast %cst_8 : f32 to vector<2x256xf32>
    %12 = arith.mulf %11, %10 : vector<2x256xf32>
    %13 = math.tanh %12 : vector<2x256xf32>
    %14 = vector.extract_strided_slice %13 {offsets = [0, 0], sizes = [2, 64], strides = [1, 1]} : vector<2x256xf32> to vector<2x64xf32>
    %cst_9 = arith.constant 5.000000e-01 : f32
    %15 = vector.broadcast %cst_9 : f32 to vector<2x64xf32>
    %16 = arith.mulf %15, %14 : vector<2x64xf32>
    %cst_10 = arith.constant 5.000000e-01 : f32
    %17 = vector.broadcast %cst_10 : f32 to vector<2x64xf32>
    %18 = arith.addf %16, %17 : vector<2x64xf32>
    %19 = vector.extract_strided_slice %13 {offsets = [0, 64], sizes = [2, 64], strides = [1, 1]} : vector<2x256xf32> to vector<2x64xf32>
    %cst_11 = arith.constant 5.000000e-01 : f32
    %20 = vector.broadcast %cst_11 : f32 to vector<2x64xf32>
    %21 = arith.mulf %20, %19 : vector<2x64xf32>
    %cst_12 = arith.constant 5.000000e-01 : f32
    %22 = vector.broadcast %cst_12 : f32 to vector<2x64xf32>
    %23 = arith.addf %21, %22 : vector<2x64xf32>
    %24 = vector.extract_strided_slice %13 {offsets = [0, 128], sizes = [2, 64], strides = [1, 1]} : vector<2x256xf32> to vector<2x64xf32>
    %25 = vector.extract_strided_slice %13 {offsets = [0, 192], sizes = [2, 64], strides = [1, 1]} : vector<2x256xf32> to vector<2x64xf32>
    %cst_13 = arith.constant 5.000000e-01 : f32
    %26 = vector.broadcast %cst_13 : f32 to vector<2x64xf32>
    %27 = arith.mulf %26, %25 : vector<2x64xf32>
    %cst_14 = arith.constant 5.000000e-01 : f32
    %28 = vector.broadcast %cst_14 : f32 to vector<2x64xf32>
    %29 = arith.addf %27, %28 : vector<2x64xf32>
    %30 = arith.mulf %23, %9 : vector<2x64xf32>
    %31 = arith.mulf %18, %24 : vector<2x64xf32>
    %32 = arith.addf %30, %31 : vector<2x64xf32>
    %33 = math.tanh %32 : vector<2x64xf32>
    %34 = arith.mulf %29, %33 : vector<2x64xf32>
    %c0_15 = arith.constant 0 : index
    %c0_16 = arith.constant 0 : index
    %35 = vector.load %arg9[%c0_15, %c0_16] : memref<2x128xf32, #tpu.memory_space<vmem>>, vector<2x64xf32>
    tpu.vector_store %arg9[%c0_15, %c0_16], %34 {strides = array<i32>} : memref<2x128xf32, #tpu.memory_space<vmem>>, vector<2x64xf32>,
    %c0_17 = arith.constant 0 : index
    %c0_18 = arith.constant 0 : index
    %36 = vector.load %arg4[%c0_17, %c0_18] : memref<128x256xf32, #tpu.memory_space<vmem>>, vector<64x256xf32>
    %cst_19 = arith.constant dense<0.000000e+00> : vector<2x256xf32>
    %37 = tpu.matmul %34, %36, %cst_19 {dimension_numbers = #tpu.dot_dimension_numbers<[1], [0], [0], [1], [0, 0, 1, 1], [], []>} : vector<2x64xf32>, vector<64x256xf32>, vector<2x256xf32> -> vector<2x256xf32>
    %38 = arith.addf %37, %8 : vector<2x256xf32>
    %cst_20 = arith.constant 5.000000e-01 : f32
    %39 = vector.broadcast %cst_20 : f32 to vector<2x256xf32>
    %40 = arith.mulf %39, %38 : vector<2x256xf32>
    %41 = math.tanh %40 : vector<2x256xf32>
    %42 = vector.extract_strided_slice %41 {offsets = [0, 0], sizes = [2, 64], strides = [1, 1]} : vector<2x256xf32> to vector<2x64xf32>
    %cst_21 = arith.constant 5.000000e-01 : f32
    %43 = vector.broadcast %cst_21 : f32 to vector<2x64xf32>
    %44 = arith.mulf %43, %42 : vector<2x64xf32>
    %cst_22 = arith.constant 5.000000e-01 : f32
    %45 = vector.broadcast %cst_22 : f32 to vector<2x64xf32>
    %46 = arith.addf %44, %45 : vector<2x64xf32>
    %47 = vector.extract_strided_slice %41 {offsets = [0, 64], sizes = [2, 64], strides = [1, 1]} : vector<2x256xf32> to vector<2x64xf32>
    %cst_23 = arith.constant 5.000000e-01 : f32
    %48 = vector.broadcast %cst_23 : f32 to vector<2x64xf32>
    %49 = arith.mulf %48, %47 : vector<2x64xf32>
    %cst_24 = arith.constant 5.000000e-01 : f32
    %50 = vector.broadcast %cst_24 : f32 to vector<2x64xf32>
    %51 = arith.addf %49, %50 : vector<2x64xf32>
    %52 = vector.extract_strided_slice %41 {offsets = [0, 128], sizes = [2, 64], strides = [1, 1]} : vector<2x256xf32> to vector<2x64xf32>
    %53 = vector.extract_strided_slice %41 {offsets = [0, 192], sizes = [2, 64], strides = [1, 1]} : vector<2x256xf32> to vector<2x64xf32>
    %cst_25 = arith.constant 5.000000e-01 : f32
    %54 = vector.broadcast %cst_25 : f32 to vector<2x64xf32>
    %55 = arith.mulf %54, %53 : vector<2x64xf32>
    %cst_26 = arith.constant 5.000000e-01 : f32
    %56 = vector.broadcast %cst_26 : f32 to vector<2x64xf32>
    %57 = arith.addf %55, %56 : vector<2x64xf32>
    %58 = arith.mulf %51, %9 : vector<2x64xf32>
    %59 = arith.mulf %46, %52 : vector<2x64xf32>
    %60 = arith.addf %58, %59 : vector<2x64xf32>
    %61 = math.tanh %60 : vector<2x64xf32>
    %62 = arith.mulf %57, %61 : vector<2x64xf32>
    %c0_27 = arith.constant 0 : index
    %c64 = arith.constant 64 : index
    %63 = vector.load %arg9[%c0_27, %c64] : memref<2x128xf32, #tpu.memory_space<vmem>>, vector<2x64xf32>
    tpu.vector_store %arg9[%c0_27, %c64], %62 {strides = array<i32>} : memref<2x128xf32, #tpu.memory_space<vmem>>, vector<2x64xf32>,
    %64 = vector.extract_strided_slice %5 {offsets = [2, 0], sizes = [2, 256], strides = [1, 1]} : vector<16x256xf32> to vector<2x256xf32>
    %c0_28 = arith.constant 0 : index
    %c0_29 = arith.constant 0 : index
    %65 = vector.load %arg2[%c0_28, %c0_29] : memref<64x256xf32, #tpu.memory_space<vmem>>, vector<64x256xf32>
    %cst_30 = arith.constant dense<0.000000e+00> : vector<2x256xf32>
    %66 = tpu.matmul %34, %65, %cst_30 {dimension_numbers = #tpu.dot_dimension_numbers<[1], [0], [0], [1], [0, 0, 1, 1], [], []>} : vector<2x64xf32>, vector<64x256xf32>, vector<2x256xf32> -> vector<2x256xf32>
    %67 = arith.addf %64, %66 : vector<2x256xf32>
    %cst_31 = arith.constant 5.000000e-01 : f32
    %68 = vector.broadcast %cst_31 : f32 to vector<2x256xf32>
    %69 = arith.mulf %68, %67 : vector<2x256xf32>
    %70 = math.tanh %69 : vector<2x256xf32>
    %71 = vector.extract_strided_slice %70 {offsets = [0, 0], sizes = [2, 64], strides = [1, 1]} : vector<2x256xf32> to vector<2x64xf32>
    %cst_32 = arith.constant 5.000000e-01 : f32
    %72 = vector.broadcast %cst_32 : f32 to vector<2x64xf32>
    %73 = arith.mulf %72, %71 : vector<2x64xf32>
    %cst_33 = arith.constant 5.000000e-01 : f32
    %74 = vector.broadcast %cst_33 : f32 to vector<2x64xf32>
    %75 = arith.addf %73, %74 : vector<2x64xf32>
    %76 = vector.extract_strided_slice %70 {offsets = [0, 64], sizes = [2, 64], strides = [1, 1]} : vector<2x256xf32> to vector<2x64xf32>
    %cst_34 = arith.constant 5.000000e-01 : f32
    %77 = vector.broadcast %cst_34 : f32 to vector<2x64xf32>
    %78 = arith.mulf %77, %76 : vector<2x64xf32>
    %cst_35 = arith.constant 5.000000e-01 : f32
    %79 = vector.broadcast %cst_35 : f32 to vector<2x64xf32>
    %80 = arith.addf %78, %79 : vector<2x64xf32>
    %81 = vector.extract_strided_slice %70 {offsets = [0, 128], sizes = [2, 64], strides = [1, 1]} : vector<2x256xf32> to vector<2x64xf32>
    %82 = vector.extract_strided_slice %70 {offsets = [0, 192], sizes = [2, 64], strides = [1, 1]} : vector<2x256xf32> to vector<2x64xf32>
    %cst_36 = arith.constant 5.000000e-01 : f32
    %83 = vector.broadcast %cst_36 : f32 to vector<2x64xf32>
    %84 = arith.mulf %83, %82 : vector<2x64xf32>
    %cst_37 = arith.constant 5.000000e-01 : f32
    %85 = vector.broadcast %cst_37 : f32 to vector<2x64xf32>
    %86 = arith.addf %84, %85 : vector<2x64xf32>
    %87 = arith.mulf %80, %32 : vector<2x64xf32>
    %88 = arith.mulf %75, %81 : vector<2x64xf32>
    %89 = arith.addf %87, %88 : vector<2x64xf32>
    %90 = math.tanh %89 : vector<2x64xf32>
    %91 = arith.mulf %86, %90 : vector<2x64xf32>
    %c0_38 = arith.constant 0 : index
    %c0_39 = arith.constant 0 : index
    %92 = vector.load %arg9[%c0_38, %c0_39] : memref<2x128xf32, #tpu.memory_space<vmem>>, vector<2x64xf32>
    tpu.vector_store %arg9[%c0_38, %c0_39], %91 {strides = array<i32>} : memref<2x128xf32, #tpu.memory_space<vmem>>, vector<2x64xf32>,
    %c0_40 = arith.constant 0 : index
    %c0_41 = arith.constant 0 : index
    %93 = vector.load %arg9[%c0_40, %c0_41] : memref<2x128xf32, #tpu.memory_space<vmem>>, vector<2x128xf32>
    %c0_42 = arith.constant 0 : index
    %c0_43 = arith.constant 0 : index
    %94 = vector.load %arg4[%c0_42, %c0_43] : memref<128x256xf32, #tpu.memory_space<vmem>>, vector<128x256xf32>
    %cst_44 = arith.constant dense<0.000000e+00> : vector<2x256xf32>
    %95 = tpu.matmul %93, %94, %cst_44 {dimension_numbers = #tpu.dot_dimension_numbers<[1], [0], [0], [1], [0, 0, 1, 1], [], []>} : vector<2x128xf32>, vector<128x256xf32>, vector<2x256xf32> -> vector<2x256xf32>
    %96 = arith.addf %95, %8 : vector<2x256xf32>
    %cst_45 = arith.constant 5.000000e-01 : f32
    %97 = vector.broadcast %cst_45 : f32 to vector<2x256xf32>
    %98 = arith.mulf %97, %96 : vector<2x256xf32>
    %99 = math.tanh %98 : vector<2x256xf32>
    %100 = vector.extract_strided_slice %99 {offsets = [0, 0], sizes = [2, 64], strides = [1, 1]} : vector<2x256xf32> to vector<2x64xf32>
    %cst_46 = arith.constant 5.000000e-01 : f32
    %101 = vector.broadcast %cst_46 : f32 to vector<2x64xf32>
    %102 = arith.mulf %101, %100 : vector<2x64xf32>
    %cst_47 = arith.constant 5.000000e-01 : f32
    %103 = vector.broadcast %cst_47 : f32 to vector<2x64xf32>
    %104 = arith.addf %102, %103 : vector<2x64xf32>
    %105 = vector.extract_strided_slice %99 {offsets = [0, 64], sizes = [2, 64], strides = [1, 1]} : vector<2x256xf32> to vector<2x64xf32>
    %cst_48 = arith.constant 5.000000e-01 : f32
    %106 = vector.broadcast %cst_48 : f32 to vector<2x64xf32>
    %107 = arith.mulf %106, %105 : vector<2x64xf32>
    %cst_49 = arith.constant 5.000000e-01 : f32
    %108 = vector.broadcast %cst_49 : f32 to vector<2x64xf32>
    %109 = arith.addf %107, %108 : vector<2x64xf32>
    %110 = vector.extract_strided_slice %99 {offsets = [0, 128], sizes = [2, 64], strides = [1, 1]} : vector<2x256xf32> to vector<2x64xf32>
    %111 = vector.extract_strided_slice %99 {offsets = [0, 192], sizes = [2, 64], strides = [1, 1]} : vector<2x256xf32> to vector<2x64xf32>
    %cst_50 = arith.constant 5.000000e-01 : f32
    %112 = vector.broadcast %cst_50 : f32 to vector<2x64xf32>
    %113 = arith.mulf %112, %111 : vector<2x64xf32>
    %cst_51 = arith.constant 5.000000e-01 : f32
    %114 = vector.broadcast %cst_51 : f32 to vector<2x64xf32>
    %115 = arith.addf %113, %114 : vector<2x64xf32>
    %116 = arith.mulf %109, %60 : vector<2x64xf32>
    %117 = arith.mulf %104, %110 : vector<2x64xf32>
    %118 = arith.addf %116, %117 : vector<2x64xf32>
    %119 = math.tanh %118 : vector<2x64xf32>
    %120 = arith.mulf %115, %119 : vector<2x64xf32>
    %c0_52 = arith.constant 0 : index
    %c64_53 = arith.constant 64 : index
    %121 = vector.load %arg9[%c0_52, %c64_53] : memref<2x128xf32, #tpu.memory_space<vmem>>, vector<2x64xf32>
    tpu.vector_store %arg9[%c0_52, %c64_53], %120 {strides = array<i32>} : memref<2x128xf32, #tpu.memory_space<vmem>>, vector<2x64xf32>,
    %122 = vector.extract_strided_slice %5 {offsets = [4, 0], sizes = [2, 256], strides = [1, 1]} : vector<16x256xf32> to vector<2x256xf32>
    %c0_54 = arith.constant 0 : index
    %c0_55 = arith.constant 0 : index
    %123 = vector.load %arg2[%c0_54, %c0_55] : memref<64x256xf32, #tpu.memory_space<vmem>>, vector<64x256xf32>
    %cst_56 = arith.constant dense<0.000000e+00> : vector<2x256xf32>
    %124 = tpu.matmul %91, %123, %cst_56 {dimension_numbers = #tpu.dot_dimension_numbers<[1], [0], [0], [1], [0, 0, 1, 1], [], []>} : vector<2x64xf32>, vector<64x256xf32>, vector<2x256xf32> -> vector<2x256xf32>
    %125 = arith.addf %122, %124 : vector<2x256xf32>
    %cst_57 = arith.constant 5.000000e-01 : f32
    %126 = vector.broadcast %cst_57 : f32 to vector<2x256xf32>
    %127 = arith.mulf %126, %125 : vector<2x256xf32>
    %128 = math.tanh %127 : vector<2x256xf32>
    %129 = vector.extract_strided_slice %128 {offsets = [0, 0], sizes = [2, 64], strides = [1, 1]} : vector<2x256xf32> to vector<2x64xf32>
    %cst_58 = arith.constant 5.000000e-01 : f32
    %130 = vector.broadcast %cst_58 : f32 to vector<2x64xf32>
    %131 = arith.mulf %130, %129 : vector<2x64xf32>
    %cst_59 = arith.constant 5.000000e-01 : f32
    %132 = vector.broadcast %cst_59 : f32 to vector<2x64xf32>
    %133 = arith.addf %131, %132 : vector<2x64xf32>
    %134 = vector.extract_strided_slice %128 {offsets = [0, 64], sizes = [2, 64], strides = [1, 1]} : vector<2x256xf32> to vector<2x64xf32>
    %cst_60 = arith.constant 5.000000e-01 : f32
    %135 = vector.broadcast %cst_60 : f32 to vector<2x64xf32>
    %136 = arith.mulf %135, %134 : vector<2x64xf32>
    %cst_61 = arith.constant 5.000000e-01 : f32
    %137 = vector.broadcast %cst_61 : f32 to vector<2x64xf32>
    %138 = arith.addf %136, %137 : vector<2x64xf32>
    %139 = vector.extract_strided_slice %128 {offsets = [0, 128], sizes = [2, 64], strides = [1, 1]} : vector<2x256xf32> to vector<2x64xf32>
    %140 = vector.extract_strided_slice %128 {offsets = [0, 192], sizes = [2, 64], strides = [1, 1]} : vector<2x256xf32> to vector<2x64xf32>
    %cst_62 = arith.constant 5.000000e-01 : f32
    %141 = vector.broadcast %cst_62 : f32 to vector<2x64xf32>
    %142 = arith.mulf %141, %140 : vector<2x64xf32>
    %cst_63 = arith.constant 5.000000e-01 : f32
    %143 = vector.broadcast %cst_63 : f32 to vector<2x64xf32>
    %144 = arith.addf %142, %143 : vector<2x64xf32>
    %145 = arith.mulf %138, %89 : vector<2x64xf32>
    %146 = arith.mulf %133, %139 : vector<2x64xf32>
    %147 = arith.addf %145, %146 : vector<2x64xf32>
    %148 = math.tanh %147 : vector<2x64xf32>
    %149 = arith.mulf %144, %148 : vector<2x64xf32>
    %c0_64 = arith.constant 0 : index
    %c0_65 = arith.constant 0 : index
    %150 = vector.load %arg9[%c0_64, %c0_65] : memref<2x128xf32, #tpu.memory_space<vmem>>, vector<2x64xf32>
    tpu.vector_store %arg9[%c0_64, %c0_65], %149 {strides = array<i32>} : memref<2x128xf32, #tpu.memory_space<vmem>>, vector<2x64xf32>,
    %c0_66 = arith.constant 0 : index
    %c0_67 = arith.constant 0 : index
    %151 = vector.load %arg9[%c0_66, %c0_67] : memref<2x128xf32, #tpu.memory_space<vmem>>, vector<2x128xf32>
    %c0_68 = arith.constant 0 : index
    %c0_69 = arith.constant 0 : index
    %152 = vector.load %arg4[%c0_68, %c0_69] : memref<128x256xf32, #tpu.memory_space<vmem>>, vector<128x256xf32>
    %cst_70 = arith.constant dense<0.000000e+00> : vector<2x256xf32>
    %153 = tpu.matmul %151, %152, %cst_70 {dimension_numbers = #tpu.dot_dimension_numbers<[1], [0], [0], [1], [0, 0, 1, 1], [], []>} : vector<2x128xf32>, vector<128x256xf32>, vector<2x256xf32> -> vector<2x256xf32>
    %154 = arith.addf %153, %8 : vector<2x256xf32>
    %cst_71 = arith.constant 5.000000e-01 : f32
    %155 = vector.broadcast %cst_71 : f32 to vector<2x256xf32>
    %156 = arith.mulf %155, %154 : vector<2x256xf32>
    %157 = math.tanh %156 : vector<2x256xf32>
    %158 = vector.extract_strided_slice %157 {offsets = [0, 0], sizes = [2, 64], strides = [1, 1]} : vector<2x256xf32> to vector<2x64xf32>
    %cst_72 = arith.constant 5.000000e-01 : f32
    %159 = vector.broadcast %cst_72 : f32 to vector<2x64xf32>
    %160 = arith.mulf %159, %158 : vector<2x64xf32>
    %cst_73 = arith.constant 5.000000e-01 : f32
    %161 = vector.broadcast %cst_73 : f32 to vector<2x64xf32>
    %162 = arith.addf %160, %161 : vector<2x64xf32>
    %163 = vector.extract_strided_slice %157 {offsets = [0, 64], sizes = [2, 64], strides = [1, 1]} : vector<2x256xf32> to vector<2x64xf32>
    %cst_74 = arith.constant 5.000000e-01 : f32
    %164 = vector.broadcast %cst_74 : f32 to vector<2x64xf32>
    %165 = arith.mulf %164, %163 : vector<2x64xf32>
    %cst_75 = arith.constant 5.000000e-01 : f32
    %166 = vector.broadcast %cst_75 : f32 to vector<2x64xf32>
    %167 = arith.addf %165, %166 : vector<2x64xf32>
    %168 = vector.extract_strided_slice %157 {offsets = [0, 128], sizes = [2, 64], strides = [1, 1]} : vector<2x256xf32> to vector<2x64xf32>
    %169 = vector.extract_strided_slice %157 {offsets = [0, 192], sizes = [2, 64], strides = [1, 1]} : vector<2x256xf32> to vector<2x64xf32>
    %cst_76 = arith.constant 5.000000e-01 : f32
    %170 = vector.broadcast %cst_76 : f32 to vector<2x64xf32>
    %171 = arith.mulf %170, %169 : vector<2x64xf32>
    %cst_77 = arith.constant 5.000000e-01 : f32
    %172 = vector.broadcast %cst_77 : f32 to vector<2x64xf32>
    %173 = arith.addf %171, %172 : vector<2x64xf32>
    %174 = arith.mulf %167, %118 : vector<2x64xf32>
    %175 = arith.mulf %162, %168 : vector<2x64xf32>
    %176 = arith.addf %174, %175 : vector<2x64xf32>
    %177 = math.tanh %176 : vector<2x64xf32>
    %178 = arith.mulf %173, %177 : vector<2x64xf32>
    %c0_78 = arith.constant 0 : index
    %c64_79 = arith.constant 64 : index
    %179 = vector.load %arg9[%c0_78, %c64_79] : memref<2x128xf32, #tpu.memory_space<vmem>>, vector<2x64xf32>
    tpu.vector_store %arg9[%c0_78, %c64_79], %178 {strides = array<i32>} : memref<2x128xf32, #tpu.memory_space<vmem>>, vector<2x64xf32>,
    %180 = vector.extract_strided_slice %5 {offsets = [6, 0], sizes = [2, 256], strides = [1, 1]} : vector<16x256xf32> to vector<2x256xf32>
    %c0_80 = arith.constant 0 : index
    %c0_81 = arith.constant 0 : index
    %181 = vector.load %arg2[%c0_80, %c0_81] : memref<64x256xf32, #tpu.memory_space<vmem>>, vector<64x256xf32>
    %cst_82 = arith.constant dense<0.000000e+00> : vector<2x256xf32>
    %182 = tpu.matmul %149, %181, %cst_82 {dimension_numbers = #tpu.dot_dimension_numbers<[1], [0], [0], [1], [0, 0, 1, 1], [], []>} : vector<2x64xf32>, vector<64x256xf32>, vector<2x256xf32> -> vector<2x256xf32>
    %183 = arith.addf %180, %182 : vector<2x256xf32>
    %cst_83 = arith.constant 5.000000e-01 : f32
    %184 = vector.broadcast %cst_83 : f32 to vector<2x256xf32>
    %185 = arith.mulf %184, %183 : vector<2x256xf32>
    %186 = math.tanh %185 : vector<2x256xf32>
    %187 = vector.extract_strided_slice %186 {offsets = [0, 0], sizes = [2, 64], strides = [1, 1]} : vector<2x256xf32> to vector<2x64xf32>
    %cst_84 = arith.constant 5.000000e-01 : f32
    %188 = vector.broadcast %cst_84 : f32 to vector<2x64xf32>
    %189 = arith.mulf %188, %187 : vector<2x64xf32>
    %cst_85 = arith.constant 5.000000e-01 : f32
    %190 = vector.broadcast %cst_85 : f32 to vector<2x64xf32>
    %191 = arith.addf %189, %190 : vector<2x64xf32>
    %192 = vector.extract_strided_slice %186 {offsets = [0, 64], sizes = [2, 64], strides = [1, 1]} : vector<2x256xf32> to vector<2x64xf32>
    %cst_86 = arith.constant 5.000000e-01 : f32
    %193 = vector.broadcast %cst_86 : f32 to vector<2x64xf32>
    %194 = arith.mulf %193, %192 : vector<2x64xf32>
    %cst_87 = arith.constant 5.000000e-01 : f32
    %195 = vector.broadcast %cst_87 : f32 to vector<2x64xf32>
    %196 = arith.addf %194, %195 : vector<2x64xf32>
    %197 = vector.extract_strided_slice %186 {offsets = [0, 128], sizes = [2, 64], strides = [1, 1]} : vector<2x256xf32> to vector<2x64xf32>
    %198 = vector.extract_strided_slice %186 {offsets = [0, 192], sizes = [2, 64], strides = [1, 1]} : vector<2x256xf32> to vector<2x64xf32>
    %cst_88 = arith.constant 5.000000e-01 : f32
    %199 = vector.broadcast %cst_88 : f32 to vector<2x64xf32>
    %200 = arith.mulf %199, %198 : vector<2x64xf32>
    %cst_89 = arith.constant 5.000000e-01 : f32
    %201 = vector.broadcast %cst_89 : f32 to vector<2x64xf32>
    %202 = arith.addf %200, %201 : vector<2x64xf32>
    %203 = arith.mulf %196, %147 : vector<2x64xf32>
    %204 = arith.mulf %191, %197 : vector<2x64xf32>
    %205 = arith.addf %203, %204 : vector<2x64xf32>
    %206 = math.tanh %205 : vector<2x64xf32>
    %207 = arith.mulf %202, %206 : vector<2x64xf32>
    %c0_90 = arith.constant 0 : index
    %c0_91 = arith.constant 0 : index
    %208 = vector.load %arg9[%c0_90, %c0_91] : memref<2x128xf32, #tpu.memory_space<vmem>>, vector<2x64xf32>
    tpu.vector_store %arg9[%c0_90, %c0_91], %207 {strides = array<i32>} : memref<2x128xf32, #tpu.memory_space<vmem>>, vector<2x64xf32>,
    %c0_92 = arith.constant 0 : index
    %c0_93 = arith.constant 0 : index
    %209 = vector.load %arg9[%c0_92, %c0_93] : memref<2x128xf32, #tpu.memory_space<vmem>>, vector<2x128xf32>
    %c0_94 = arith.constant 0 : index
    %c0_95 = arith.constant 0 : index
    %210 = vector.load %arg4[%c0_94, %c0_95] : memref<128x256xf32, #tpu.memory_space<vmem>>, vector<128x256xf32>
    %cst_96 = arith.constant dense<0.000000e+00> : vector<2x256xf32>
    %211 = tpu.matmul %209, %210, %cst_96 {dimension_numbers = #tpu.dot_dimension_numbers<[1], [0], [0], [1], [0, 0, 1, 1], [], []>} : vector<2x128xf32>, vector<128x256xf32>, vector<2x256xf32> -> vector<2x256xf32>
    %212 = arith.addf %211, %8 : vector<2x256xf32>
    %cst_97 = arith.constant 5.000000e-01 : f32
    %213 = vector.broadcast %cst_97 : f32 to vector<2x256xf32>
    %214 = arith.mulf %213, %212 : vector<2x256xf32>
    %215 = math.tanh %214 : vector<2x256xf32>
    %216 = vector.extract_strided_slice %215 {offsets = [0, 0], sizes = [2, 64], strides = [1, 1]} : vector<2x256xf32> to vector<2x64xf32>
    %cst_98 = arith.constant 5.000000e-01 : f32
    %217 = vector.broadcast %cst_98 : f32 to vector<2x64xf32>
    %218 = arith.mulf %217, %216 : vector<2x64xf32>
    %cst_99 = arith.constant 5.000000e-01 : f32
    %219 = vector.broadcast %cst_99 : f32 to vector<2x64xf32>
    %220 = arith.addf %218, %219 : vector<2x64xf32>
    %221 = vector.extract_strided_slice %215 {offsets = [0, 64], sizes = [2, 64], strides = [1, 1]} : vector<2x256xf32> to vector<2x64xf32>
    %cst_100 = arith.constant 5.000000e-01 : f32
    %222 = vector.broadcast %cst_100 : f32 to vector<2x64xf32>
    %223 = arith.mulf %222, %221 : vector<2x64xf32>
    %cst_101 = arith.constant 5.000000e-01 : f32
    %224 = vector.broadcast %cst_101 : f32 to vector<2x64xf32>
    %225 = arith.addf %223, %224 : vector<2x64xf32>
    %226 = vector.extract_strided_slice %215 {offsets = [0, 128], sizes = [2, 64], strides = [1, 1]} : vector<2x256xf32> to vector<2x64xf32>
    %227 = vector.extract_strided_slice %215 {offsets = [0, 192], sizes = [2, 64], strides = [1, 1]} : vector<2x256xf32> to vector<2x64xf32>
    %cst_102 = arith.constant 5.000000e-01 : f32
    %228 = vector.broadcast %cst_102 : f32 to vector<2x64xf32>
    %229 = arith.mulf %228, %227 : vector<2x64xf32>
    %cst_103 = arith.constant 5.000000e-01 : f32
    %230 = vector.broadcast %cst_103 : f32 to vector<2x64xf32>
    %231 = arith.addf %229, %230 : vector<2x64xf32>
    %232 = arith.mulf %225, %176 : vector<2x64xf32>
    %233 = arith.mulf %220, %226 : vector<2x64xf32>
    %234 = arith.addf %232, %233 : vector<2x64xf32>
    %235 = math.tanh %234 : vector<2x64xf32>
    %236 = arith.mulf %231, %235 : vector<2x64xf32>
    %c0_104 = arith.constant 0 : index
    %c64_105 = arith.constant 64 : index
    %237 = vector.load %arg9[%c0_104, %c64_105] : memref<2x128xf32, #tpu.memory_space<vmem>>, vector<2x64xf32>
    tpu.vector_store %arg9[%c0_104, %c64_105], %236 {strides = array<i32>} : memref<2x128xf32, #tpu.memory_space<vmem>>, vector<2x64xf32>,
    %238 = vector.extract_strided_slice %5 {offsets = [8, 0], sizes = [2, 256], strides = [1, 1]} : vector<16x256xf32> to vector<2x256xf32>
    %c0_106 = arith.constant 0 : index
    %c0_107 = arith.constant 0 : index
    %239 = vector.load %arg2[%c0_106, %c0_107] : memref<64x256xf32, #tpu.memory_space<vmem>>, vector<64x256xf32>
    %cst_108 = arith.constant dense<0.000000e+00> : vector<2x256xf32>
    %240 = tpu.matmul %207, %239, %cst_108 {dimension_numbers = #tpu.dot_dimension_numbers<[1], [0], [0], [1], [0, 0, 1, 1], [], []>} : vector<2x64xf32>, vector<64x256xf32>, vector<2x256xf32> -> vector<2x256xf32>
    %241 = arith.addf %238, %240 : vector<2x256xf32>
    %cst_109 = arith.constant 5.000000e-01 : f32
    %242 = vector.broadcast %cst_109 : f32 to vector<2x256xf32>
    %243 = arith.mulf %242, %241 : vector<2x256xf32>
    %244 = math.tanh %243 : vector<2x256xf32>
    %245 = vector.extract_strided_slice %244 {offsets = [0, 0], sizes = [2, 64], strides = [1, 1]} : vector<2x256xf32> to vector<2x64xf32>
    %cst_110 = arith.constant 5.000000e-01 : f32
    %246 = vector.broadcast %cst_110 : f32 to vector<2x64xf32>
    %247 = arith.mulf %246, %245 : vector<2x64xf32>
    %cst_111 = arith.constant 5.000000e-01 : f32
    %248 = vector.broadcast %cst_111 : f32 to vector<2x64xf32>
    %249 = arith.addf %247, %248 : vector<2x64xf32>
    %250 = vector.extract_strided_slice %244 {offsets = [0, 64], sizes = [2, 64], strides = [1, 1]} : vector<2x256xf32> to vector<2x64xf32>
    %cst_112 = arith.constant 5.000000e-01 : f32
    %251 = vector.broadcast %cst_112 : f32 to vector<2x64xf32>
    %252 = arith.mulf %251, %250 : vector<2x64xf32>
    %cst_113 = arith.constant 5.000000e-01 : f32
    %253 = vector.broadcast %cst_113 : f32 to vector<2x64xf32>
    %254 = arith.addf %252, %253 : vector<2x64xf32>
    %255 = vector.extract_strided_slice %244 {offsets = [0, 128], sizes = [2, 64], strides = [1, 1]} : vector<2x256xf32> to vector<2x64xf32>
    %256 = vector.extract_strided_slice %244 {offsets = [0, 192], sizes = [2, 64], strides = [1, 1]} : vector<2x256xf32> to vector<2x64xf32>
    %cst_114 = arith.constant 5.000000e-01 : f32
    %257 = vector.broadcast %cst_114 : f32 to vector<2x64xf32>
    %258 = arith.mulf %257, %256 : vector<2x64xf32>
    %cst_115 = arith.constant 5.000000e-01 : f32
    %259 = vector.broadcast %cst_115 : f32 to vector<2x64xf32>
    %260 = arith.addf %258, %259 : vector<2x64xf32>
    %261 = arith.mulf %254, %205 : vector<2x64xf32>
    %262 = arith.mulf %249, %255 : vector<2x64xf32>
    %263 = arith.addf %261, %262 : vector<2x64xf32>
    %264 = math.tanh %263 : vector<2x64xf32>
    %265 = arith.mulf %260, %264 : vector<2x64xf32>
    %c0_116 = arith.constant 0 : index
    %c0_117 = arith.constant 0 : index
    %266 = vector.load %arg9[%c0_116, %c0_117] : memref<2x128xf32, #tpu.memory_space<vmem>>, vector<2x64xf32>
    tpu.vector_store %arg9[%c0_116, %c0_117], %265 {strides = array<i32>} : memref<2x128xf32, #tpu.memory_space<vmem>>, vector<2x64xf32>,
    %c0_118 = arith.constant 0 : index
    %c0_119 = arith.constant 0 : index
    %267 = vector.load %arg9[%c0_118, %c0_119] : memref<2x128xf32, #tpu.memory_space<vmem>>, vector<2x128xf32>
    %c0_120 = arith.constant 0 : index
    %c0_121 = arith.constant 0 : index
    %268 = vector.load %arg4[%c0_120, %c0_121] : memref<128x256xf32, #tpu.memory_space<vmem>>, vector<128x256xf32>
    %cst_122 = arith.constant dense<0.000000e+00> : vector<2x256xf32>
    %269 = tpu.matmul %267, %268, %cst_122 {dimension_numbers = #tpu.dot_dimension_numbers<[1], [0], [0], [1], [0, 0, 1, 1], [], []>} : vector<2x128xf32>, vector<128x256xf32>, vector<2x256xf32> -> vector<2x256xf32>
    %270 = arith.addf %269, %8 : vector<2x256xf32>
    %cst_123 = arith.constant 5.000000e-01 : f32
    %271 = vector.broadcast %cst_123 : f32 to vector<2x256xf32>
    %272 = arith.mulf %271, %270 : vector<2x256xf32>
    %273 = math.tanh %272 : vector<2x256xf32>
    %274 = vector.extract_strided_slice %273 {offsets = [0, 0], sizes = [2, 64], strides = [1, 1]} : vector<2x256xf32> to vector<2x64xf32>
    %cst_124 = arith.constant 5.000000e-01 : f32
    %275 = vector.broadcast %cst_124 : f32 to vector<2x64xf32>
    %276 = arith.mulf %275, %274 : vector<2x64xf32>
    %cst_125 = arith.constant 5.000000e-01 : f32
    %277 = vector.broadcast %cst_125 : f32 to vector<2x64xf32>
    %278 = arith.addf %276, %277 : vector<2x64xf32>
    %279 = vector.extract_strided_slice %273 {offsets = [0, 64], sizes = [2, 64], strides = [1, 1]} : vector<2x256xf32> to vector<2x64xf32>
    %cst_126 = arith.constant 5.000000e-01 : f32
    %280 = vector.broadcast %cst_126 : f32 to vector<2x64xf32>
    %281 = arith.mulf %280, %279 : vector<2x64xf32>
    %cst_127 = arith.constant 5.000000e-01 : f32
    %282 = vector.broadcast %cst_127 : f32 to vector<2x64xf32>
    %283 = arith.addf %281, %282 : vector<2x64xf32>
    %284 = vector.extract_strided_slice %273 {offsets = [0, 128], sizes = [2, 64], strides = [1, 1]} : vector<2x256xf32> to vector<2x64xf32>
    %285 = vector.extract_strided_slice %273 {offsets = [0, 192], sizes = [2, 64], strides = [1, 1]} : vector<2x256xf32> to vector<2x64xf32>
    %cst_128 = arith.constant 5.000000e-01 : f32
    %286 = vector.broadcast %cst_128 : f32 to vector<2x64xf32>
    %287 = arith.mulf %286, %285 : vector<2x64xf32>
    %cst_129 = arith.constant 5.000000e-01 : f32
    %288 = vector.broadcast %cst_129 : f32 to vector<2x64xf32>
    %289 = arith.addf %287, %288 : vector<2x64xf32>
    %290 = arith.mulf %283, %234 : vector<2x64xf32>
    %291 = arith.mulf %278, %284 : vector<2x64xf32>
    %292 = arith.addf %290, %291 : vector<2x64xf32>
    %293 = math.tanh %292 : vector<2x64xf32>
    %294 = arith.mulf %289, %293 : vector<2x64xf32>
    %c0_130 = arith.constant 0 : index
    %c64_131 = arith.constant 64 : index
    %295 = vector.load %arg9[%c0_130, %c64_131] : memref<2x128xf32, #tpu.memory_space<vmem>>, vector<2x64xf32>
    tpu.vector_store %arg9[%c0_130, %c64_131], %294 {strides = array<i32>} : memref<2x128xf32, #tpu.memory_space<vmem>>, vector<2x64xf32>,
    %296 = vector.extract_strided_slice %5 {offsets = [10, 0], sizes = [2, 256], strides = [1, 1]} : vector<16x256xf32> to vector<2x256xf32>
    %c0_132 = arith.constant 0 : index
    %c0_133 = arith.constant 0 : index
    %297 = vector.load %arg2[%c0_132, %c0_133] : memref<64x256xf32, #tpu.memory_space<vmem>>, vector<64x256xf32>
    %cst_134 = arith.constant dense<0.000000e+00> : vector<2x256xf32>
    %298 = tpu.matmul %265, %297, %cst_134 {dimension_numbers = #tpu.dot_dimension_numbers<[1], [0], [0], [1], [0, 0, 1, 1], [], []>} : vector<2x64xf32>, vector<64x256xf32>, vector<2x256xf32> -> vector<2x256xf32>
    %299 = arith.addf %296, %298 : vector<2x256xf32>
    %cst_135 = arith.constant 5.000000e-01 : f32
    %300 = vector.broadcast %cst_135 : f32 to vector<2x256xf32>
    %301 = arith.mulf %300, %299 : vector<2x256xf32>
    %302 = math.tanh %301 : vector<2x256xf32>
    %303 = vector.extract_strided_slice %302 {offsets = [0, 0], sizes = [2, 64], strides = [1, 1]} : vector<2x256xf32> to vector<2x64xf32>
    %cst_136 = arith.constant 5.000000e-01 : f32
    %304 = vector.broadcast %cst_136 : f32 to vector<2x64xf32>
    %305 = arith.mulf %304, %303 : vector<2x64xf32>
    %cst_137 = arith.constant 5.000000e-01 : f32
    %306 = vector.broadcast %cst_137 : f32 to vector<2x64xf32>
    %307 = arith.addf %305, %306 : vector<2x64xf32>
    %308 = vector.extract_strided_slice %302 {offsets = [0, 64], sizes = [2, 64], strides = [1, 1]} : vector<2x256xf32> to vector<2x64xf32>
    %cst_138 = arith.constant 5.000000e-01 : f32
    %309 = vector.broadcast %cst_138 : f32 to vector<2x64xf32>
    %310 = arith.mulf %309, %308 : vector<2x64xf32>
    %cst_139 = arith.constant 5.000000e-01 : f32
    %311 = vector.broadcast %cst_139 : f32 to vector<2x64xf32>
    %312 = arith.addf %310, %311 : vector<2x64xf32>
    %313 = vector.extract_strided_slice %302 {offsets = [0, 128], sizes = [2, 64], strides = [1, 1]} : vector<2x256xf32> to vector<2x64xf32>
    %314 = vector.extract_strided_slice %302 {offsets = [0, 192], sizes = [2, 64], strides = [1, 1]} : vector<2x256xf32> to vector<2x64xf32>
    %cst_140 = arith.constant 5.000000e-01 : f32
    %315 = vector.broadcast %cst_140 : f32 to vector<2x64xf32>
    %316 = arith.mulf %315, %314 : vector<2x64xf32>
    %cst_141 = arith.constant 5.000000e-01 : f32
    %317 = vector.broadcast %cst_141 : f32 to vector<2x64xf32>
    %318 = arith.addf %316, %317 : vector<2x64xf32>
    %319 = arith.mulf %312, %263 : vector<2x64xf32>
    %320 = arith.mulf %307, %313 : vector<2x64xf32>
    %321 = arith.addf %319, %320 : vector<2x64xf32>
    %322 = math.tanh %321 : vector<2x64xf32>
    %323 = arith.mulf %318, %322 : vector<2x64xf32>
    %c0_142 = arith.constant 0 : index
    %c0_143 = arith.constant 0 : index
    %324 = vector.load %arg9[%c0_142, %c0_143] : memref<2x128xf32, #tpu.memory_space<vmem>>, vector<2x64xf32>
    tpu.vector_store %arg9[%c0_142, %c0_143], %323 {strides = array<i32>} : memref<2x128xf32, #tpu.memory_space<vmem>>, vector<2x64xf32>,
    %c0_144 = arith.constant 0 : index
    %c0_145 = arith.constant 0 : index
    %325 = vector.load %arg9[%c0_144, %c0_145] : memref<2x128xf32, #tpu.memory_space<vmem>>, vector<2x128xf32>
    %c0_146 = arith.constant 0 : index
    %c0_147 = arith.constant 0 : index
    %326 = vector.load %arg4[%c0_146, %c0_147] : memref<128x256xf32, #tpu.memory_space<vmem>>, vector<128x256xf32>
    %cst_148 = arith.constant dense<0.000000e+00> : vector<2x256xf32>
    %327 = tpu.matmul %325, %326, %cst_148 {dimension_numbers = #tpu.dot_dimension_numbers<[1], [0], [0], [1], [0, 0, 1, 1], [], []>} : vector<2x128xf32>, vector<128x256xf32>, vector<2x256xf32> -> vector<2x256xf32>
    %328 = arith.addf %327, %8 : vector<2x256xf32>
    %cst_149 = arith.constant 5.000000e-01 : f32
    %329 = vector.broadcast %cst_149 : f32 to vector<2x256xf32>
    %330 = arith.mulf %329, %328 : vector<2x256xf32>
    %331 = math.tanh %330 : vector<2x256xf32>
    %332 = vector.extract_strided_slice %331 {offsets = [0, 0], sizes = [2, 64], strides = [1, 1]} : vector<2x256xf32> to vector<2x64xf32>
    %cst_150 = arith.constant 5.000000e-01 : f32
    %333 = vector.broadcast %cst_150 : f32 to vector<2x64xf32>
    %334 = arith.mulf %333, %332 : vector<2x64xf32>
    %cst_151 = arith.constant 5.000000e-01 : f32
    %335 = vector.broadcast %cst_151 : f32 to vector<2x64xf32>
    %336 = arith.addf %334, %335 : vector<2x64xf32>
    %337 = vector.extract_strided_slice %331 {offsets = [0, 64], sizes = [2, 64], strides = [1, 1]} : vector<2x256xf32> to vector<2x64xf32>
    %cst_152 = arith.constant 5.000000e-01 : f32
    %338 = vector.broadcast %cst_152 : f32 to vector<2x64xf32>
    %339 = arith.mulf %338, %337 : vector<2x64xf32>
    %cst_153 = arith.constant 5.000000e-01 : f32
    %340 = vector.broadcast %cst_153 : f32 to vector<2x64xf32>
    %341 = arith.addf %339, %340 : vector<2x64xf32>
    %342 = vector.extract_strided_slice %331 {offsets = [0, 128], sizes = [2, 64], strides = [1, 1]} : vector<2x256xf32> to vector<2x64xf32>
    %343 = vector.extract_strided_slice %331 {offsets = [0, 192], sizes = [2, 64], strides = [1, 1]} : vector<2x256xf32> to vector<2x64xf32>
    %cst_154 = arith.constant 5.000000e-01 : f32
    %344 = vector.broadcast %cst_154 : f32 to vector<2x64xf32>
    %345 = arith.mulf %344, %343 : vector<2x64xf32>
    %cst_155 = arith.constant 5.000000e-01 : f32
    %346 = vector.broadcast %cst_155 : f32 to vector<2x64xf32>
    %347 = arith.addf %345, %346 : vector<2x64xf32>
    %348 = arith.mulf %341, %292 : vector<2x64xf32>
    %349 = arith.mulf %336, %342 : vector<2x64xf32>
    %350 = arith.addf %348, %349 : vector<2x64xf32>
    %351 = math.tanh %350 : vector<2x64xf32>
    %352 = arith.mulf %347, %351 : vector<2x64xf32>
    %c0_156 = arith.constant 0 : index
    %c64_157 = arith.constant 64 : index
    %353 = vector.load %arg9[%c0_156, %c64_157] : memref<2x128xf32, #tpu.memory_space<vmem>>, vector<2x64xf32>
    tpu.vector_store %arg9[%c0_156, %c64_157], %352 {strides = array<i32>} : memref<2x128xf32, #tpu.memory_space<vmem>>, vector<2x64xf32>,
    %354 = vector.extract_strided_slice %5 {offsets = [12, 0], sizes = [2, 256], strides = [1, 1]} : vector<16x256xf32> to vector<2x256xf32>
    %c0_158 = arith.constant 0 : index
    %c0_159 = arith.constant 0 : index
    %355 = vector.load %arg2[%c0_158, %c0_159] : memref<64x256xf32, #tpu.memory_space<vmem>>, vector<64x256xf32>
    %cst_160 = arith.constant dense<0.000000e+00> : vector<2x256xf32>
    %356 = tpu.matmul %323, %355, %cst_160 {dimension_numbers = #tpu.dot_dimension_numbers<[1], [0], [0], [1], [0, 0, 1, 1], [], []>} : vector<2x64xf32>, vector<64x256xf32>, vector<2x256xf32> -> vector<2x256xf32>
    %357 = arith.addf %354, %356 : vector<2x256xf32>
    %cst_161 = arith.constant 5.000000e-01 : f32
    %358 = vector.broadcast %cst_161 : f32 to vector<2x256xf32>
    %359 = arith.mulf %358, %357 : vector<2x256xf32>
    %360 = math.tanh %359 : vector<2x256xf32>
    %361 = vector.extract_strided_slice %360 {offsets = [0, 0], sizes = [2, 64], strides = [1, 1]} : vector<2x256xf32> to vector<2x64xf32>
    %cst_162 = arith.constant 5.000000e-01 : f32
    %362 = vector.broadcast %cst_162 : f32 to vector<2x64xf32>
    %363 = arith.mulf %362, %361 : vector<2x64xf32>
    %cst_163 = arith.constant 5.000000e-01 : f32
    %364 = vector.broadcast %cst_163 : f32 to vector<2x64xf32>
    %365 = arith.addf %363, %364 : vector<2x64xf32>
    %366 = vector.extract_strided_slice %360 {offsets = [0, 64], sizes = [2, 64], strides = [1, 1]} : vector<2x256xf32> to vector<2x64xf32>
    %cst_164 = arith.constant 5.000000e-01 : f32
    %367 = vector.broadcast %cst_164 : f32 to vector<2x64xf32>
    %368 = arith.mulf %367, %366 : vector<2x64xf32>
    %cst_165 = arith.constant 5.000000e-01 : f32
    %369 = vector.broadcast %cst_165 : f32 to vector<2x64xf32>
    %370 = arith.addf %368, %369 : vector<2x64xf32>
    %371 = vector.extract_strided_slice %360 {offsets = [0, 128], sizes = [2, 64], strides = [1, 1]} : vector<2x256xf32> to vector<2x64xf32>
    %372 = vector.extract_strided_slice %360 {offsets = [0, 192], sizes = [2, 64], strides = [1, 1]} : vector<2x256xf32> to vector<2x64xf32>
    %cst_166 = arith.constant 5.000000e-01 : f32
    %373 = vector.broadcast %cst_166 : f32 to vector<2x64xf32>
    %374 = arith.mulf %373, %372 : vector<2x64xf32>
    %cst_167 = arith.constant 5.000000e-01 : f32
    %375 = vector.broadcast %cst_167 : f32 to vector<2x64xf32>
    %376 = arith.addf %374, %375 : vector<2x64xf32>
    %377 = arith.mulf %370, %321 : vector<2x64xf32>
    %378 = arith.mulf %365, %371 : vector<2x64xf32>
    %379 = arith.addf %377, %378 : vector<2x64xf32>
    %380 = math.tanh %379 : vector<2x64xf32>
    %381 = arith.mulf %376, %380 : vector<2x64xf32>
    %c0_168 = arith.constant 0 : index
    %c0_169 = arith.constant 0 : index
    %382 = vector.load %arg9[%c0_168, %c0_169] : memref<2x128xf32, #tpu.memory_space<vmem>>, vector<2x64xf32>
    tpu.vector_store %arg9[%c0_168, %c0_169], %381 {strides = array<i32>} : memref<2x128xf32, #tpu.memory_space<vmem>>, vector<2x64xf32>,
    %c0_170 = arith.constant 0 : index
    %c0_171 = arith.constant 0 : index
    %383 = vector.load %arg9[%c0_170, %c0_171] : memref<2x128xf32, #tpu.memory_space<vmem>>, vector<2x128xf32>
    %c0_172 = arith.constant 0 : index
    %c0_173 = arith.constant 0 : index
    %384 = vector.load %arg4[%c0_172, %c0_173] : memref<128x256xf32, #tpu.memory_space<vmem>>, vector<128x256xf32>
    %cst_174 = arith.constant dense<0.000000e+00> : vector<2x256xf32>
    %385 = tpu.matmul %383, %384, %cst_174 {dimension_numbers = #tpu.dot_dimension_numbers<[1], [0], [0], [1], [0, 0, 1, 1], [], []>} : vector<2x128xf32>, vector<128x256xf32>, vector<2x256xf32> -> vector<2x256xf32>
    %386 = arith.addf %385, %8 : vector<2x256xf32>
    %cst_175 = arith.constant 5.000000e-01 : f32
    %387 = vector.broadcast %cst_175 : f32 to vector<2x256xf32>
    %388 = arith.mulf %387, %386 : vector<2x256xf32>
    %389 = math.tanh %388 : vector<2x256xf32>
    %390 = vector.extract_strided_slice %389 {offsets = [0, 0], sizes = [2, 64], strides = [1, 1]} : vector<2x256xf32> to vector<2x64xf32>
    %cst_176 = arith.constant 5.000000e-01 : f32
    %391 = vector.broadcast %cst_176 : f32 to vector<2x64xf32>
    %392 = arith.mulf %391, %390 : vector<2x64xf32>
    %cst_177 = arith.constant 5.000000e-01 : f32
    %393 = vector.broadcast %cst_177 : f32 to vector<2x64xf32>
    %394 = arith.addf %392, %393 : vector<2x64xf32>
    %395 = vector.extract_strided_slice %389 {offsets = [0, 64], sizes = [2, 64], strides = [1, 1]} : vector<2x256xf32> to vector<2x64xf32>
    %cst_178 = arith.constant 5.000000e-01 : f32
    %396 = vector.broadcast %cst_178 : f32 to vector<2x64xf32>
    %397 = arith.mulf %396, %395 : vector<2x64xf32>
    %cst_179 = arith.constant 5.000000e-01 : f32
    %398 = vector.broadcast %cst_179 : f32 to vector<2x64xf32>
    %399 = arith.addf %397, %398 : vector<2x64xf32>
    %400 = vector.extract_strided_slice %389 {offsets = [0, 128], sizes = [2, 64], strides = [1, 1]} : vector<2x256xf32> to vector<2x64xf32>
    %401 = vector.extract_strided_slice %389 {offsets = [0, 192], sizes = [2, 64], strides = [1, 1]} : vector<2x256xf32> to vector<2x64xf32>
    %cst_180 = arith.constant 5.000000e-01 : f32
    %402 = vector.broadcast %cst_180 : f32 to vector<2x64xf32>
    %403 = arith.mulf %402, %401 : vector<2x64xf32>
    %cst_181 = arith.constant 5.000000e-01 : f32
    %404 = vector.broadcast %cst_181 : f32 to vector<2x64xf32>
    %405 = arith.addf %403, %404 : vector<2x64xf32>
    %406 = arith.mulf %399, %350 : vector<2x64xf32>
    %407 = arith.mulf %394, %400 : vector<2x64xf32>
    %408 = arith.addf %406, %407 : vector<2x64xf32>
    %409 = math.tanh %408 : vector<2x64xf32>
    %410 = arith.mulf %405, %409 : vector<2x64xf32>
    %c0_182 = arith.constant 0 : index
    %c64_183 = arith.constant 64 : index
    %411 = vector.load %arg9[%c0_182, %c64_183] : memref<2x128xf32, #tpu.memory_space<vmem>>, vector<2x64xf32>
    tpu.vector_store %arg9[%c0_182, %c64_183], %410 {strides = array<i32>} : memref<2x128xf32, #tpu.memory_space<vmem>>, vector<2x64xf32>,
    %412 = vector.extract_strided_slice %5 {offsets = [14, 0], sizes = [2, 256], strides = [1, 1]} : vector<16x256xf32> to vector<2x256xf32>
    %c0_184 = arith.constant 0 : index
    %c0_185 = arith.constant 0 : index
    %413 = vector.load %arg2[%c0_184, %c0_185] : memref<64x256xf32, #tpu.memory_space<vmem>>, vector<64x256xf32>
    %cst_186 = arith.constant dense<0.000000e+00> : vector<2x256xf32>
    %414 = tpu.matmul %381, %413, %cst_186 {dimension_numbers = #tpu.dot_dimension_numbers<[1], [0], [0], [1], [0, 0, 1, 1], [], []>} : vector<2x64xf32>, vector<64x256xf32>, vector<2x256xf32> -> vector<2x256xf32>
    %415 = arith.addf %412, %414 : vector<2x256xf32>
    %cst_187 = arith.constant 5.000000e-01 : f32
    %416 = vector.broadcast %cst_187 : f32 to vector<2x256xf32>
    %417 = arith.mulf %416, %415 : vector<2x256xf32>
    %418 = math.tanh %417 : vector<2x256xf32>
    %419 = vector.extract_strided_slice %418 {offsets = [0, 0], sizes = [2, 64], strides = [1, 1]} : vector<2x256xf32> to vector<2x64xf32>
    %cst_188 = arith.constant 5.000000e-01 : f32
    %420 = vector.broadcast %cst_188 : f32 to vector<2x64xf32>
    %421 = arith.mulf %420, %419 : vector<2x64xf32>
    %cst_189 = arith.constant 5.000000e-01 : f32
    %422 = vector.broadcast %cst_189 : f32 to vector<2x64xf32>
    %423 = arith.addf %421, %422 : vector<2x64xf32>
    %424 = vector.extract_strided_slice %418 {offsets = [0, 64], sizes = [2, 64], strides = [1, 1]} : vector<2x256xf32> to vector<2x64xf32>
    %cst_190 = arith.constant 5.000000e-01 : f32
    %425 = vector.broadcast %cst_190 : f32 to vector<2x64xf32>
    %426 = arith.mulf %425, %424 : vector<2x64xf32>
    %cst_191 = arith.constant 5.000000e-01 : f32
    %427 = vector.broadcast %cst_191 : f32 to vector<2x64xf32>
    %428 = arith.addf %426, %427 : vector<2x64xf32>
    %429 = vector.extract_strided_slice %418 {offsets = [0, 128], sizes = [2, 64], strides = [1, 1]} : vector<2x256xf32> to vector<2x64xf32>
    %430 = vector.extract_strided_slice %418 {offsets = [0, 192], sizes = [2, 64], strides = [1, 1]} : vector<2x256xf32> to vector<2x64xf32>
    %cst_192 = arith.constant 5.000000e-01 : f32
    %431 = vector.broadcast %cst_192 : f32 to vector<2x64xf32>
    %432 = arith.mulf %431, %430 : vector<2x64xf32>
    %cst_193 = arith.constant 5.000000e-01 : f32
    %433 = vector.broadcast %cst_193 : f32 to vector<2x64xf32>
    %434 = arith.addf %432, %433 : vector<2x64xf32>
    %435 = arith.mulf %428, %379 : vector<2x64xf32>
    %436 = arith.mulf %423, %429 : vector<2x64xf32>
    %437 = arith.addf %435, %436 : vector<2x64xf32>
    %438 = math.tanh %437 : vector<2x64xf32>
    %439 = arith.mulf %434, %438 : vector<2x64xf32>
    %c0_194 = arith.constant 0 : index
    %c0_195 = arith.constant 0 : index
    %440 = vector.load %arg9[%c0_194, %c0_195] : memref<2x128xf32, #tpu.memory_space<vmem>>, vector<2x64xf32>
    tpu.vector_store %arg9[%c0_194, %c0_195], %439 {strides = array<i32>} : memref<2x128xf32, #tpu.memory_space<vmem>>, vector<2x64xf32>,
    %c0_196 = arith.constant 0 : index
    %c0_197 = arith.constant 0 : index
    %441 = vector.load %arg9[%c0_196, %c0_197] : memref<2x128xf32, #tpu.memory_space<vmem>>, vector<2x128xf32>
    %c0_198 = arith.constant 0 : index
    %c0_199 = arith.constant 0 : index
    %442 = vector.load %arg4[%c0_198, %c0_199] : memref<128x256xf32, #tpu.memory_space<vmem>>, vector<128x256xf32>
    %cst_200 = arith.constant dense<0.000000e+00> : vector<2x256xf32>
    %443 = tpu.matmul %441, %442, %cst_200 {dimension_numbers = #tpu.dot_dimension_numbers<[1], [0], [0], [1], [0, 0, 1, 1], [], []>} : vector<2x128xf32>, vector<128x256xf32>, vector<2x256xf32> -> vector<2x256xf32>
    %444 = arith.addf %443, %8 : vector<2x256xf32>
    %cst_201 = arith.constant 5.000000e-01 : f32
    %445 = vector.broadcast %cst_201 : f32 to vector<2x256xf32>
    %446 = arith.mulf %445, %444 : vector<2x256xf32>
    %447 = math.tanh %446 : vector<2x256xf32>
    %448 = vector.extract_strided_slice %447 {offsets = [0, 0], sizes = [2, 64], strides = [1, 1]} : vector<2x256xf32> to vector<2x64xf32>
    %cst_202 = arith.constant 5.000000e-01 : f32
    %449 = vector.broadcast %cst_202 : f32 to vector<2x64xf32>
    %450 = arith.mulf %449, %448 : vector<2x64xf32>
    %cst_203 = arith.constant 5.000000e-01 : f32
    %451 = vector.broadcast %cst_203 : f32 to vector<2x64xf32>
    %452 = arith.addf %450, %451 : vector<2x64xf32>
    %453 = vector.extract_strided_slice %447 {offsets = [0, 64], sizes = [2, 64], strides = [1, 1]} : vector<2x256xf32> to vector<2x64xf32>
    %cst_204 = arith.constant 5.000000e-01 : f32
    %454 = vector.broadcast %cst_204 : f32 to vector<2x64xf32>
    %455 = arith.mulf %454, %453 : vector<2x64xf32>
    %cst_205 = arith.constant 5.000000e-01 : f32
    %456 = vector.broadcast %cst_205 : f32 to vector<2x64xf32>
    %457 = arith.addf %455, %456 : vector<2x64xf32>
    %458 = vector.extract_strided_slice %447 {offsets = [0, 128], sizes = [2, 64], strides = [1, 1]} : vector<2x256xf32> to vector<2x64xf32>
    %459 = vector.extract_strided_slice %447 {offsets = [0, 192], sizes = [2, 64], strides = [1, 1]} : vector<2x256xf32> to vector<2x64xf32>
    %cst_206 = arith.constant 5.000000e-01 : f32
    %460 = vector.broadcast %cst_206 : f32 to vector<2x64xf32>
    %461 = arith.mulf %460, %459 : vector<2x64xf32>
    %cst_207 = arith.constant 5.000000e-01 : f32
    %462 = vector.broadcast %cst_207 : f32 to vector<2x64xf32>
    %463 = arith.addf %461, %462 : vector<2x64xf32>
    %464 = arith.mulf %457, %408 : vector<2x64xf32>
    %465 = arith.mulf %452, %458 : vector<2x64xf32>
    %466 = arith.addf %464, %465 : vector<2x64xf32>
    %467 = math.tanh %466 : vector<2x64xf32>
    %468 = arith.mulf %463, %467 : vector<2x64xf32>
    %c0_208 = arith.constant 0 : index
    %c0_209 = arith.constant 0 : index
    %469 = vector.load %arg6[%c0_208, %c0_209] : memref<1x64xf32, #tpu.memory_space<vmem>>, vector<1x64xf32>
    %470 = vector.broadcast %469 : vector<1x64xf32> to vector<2x64xf32>
    %471 = arith.mulf %468, %470 : vector<2x64xf32>
    %cst_210 = arith.constant dense<0.000000e+00> : vector<2xf32>
    %472 = vector.multi_reduction <add>, %471, %cst_210 [1] : vector<2x64xf32> to vector<2xf32>
    %473 = vector.shape_cast %472 : vector<2xf32> to vector<2x1xf32>
    %c0_211 = arith.constant 0 : index
    %c0_212 = arith.constant 0 : index
    %474 = vector.load %arg7[%c0_211, %c0_212] : memref<1x1xf32, #tpu.memory_space<vmem>>, vector<1x1xf32>
    %475 = vector.broadcast %474 : vector<1x1xf32> to vector<2x1xf32>
    %476 = arith.addf %473, %475 : vector<2x1xf32>
    %477 = arith.negf %476 : vector<2x1xf32>
    %478 = math.exp %477 : vector<2x1xf32>
    %cst_213 = arith.constant 1.000000e+00 : f32
    %479 = vector.broadcast %cst_213 : f32 to vector<2x1xf32>
    %480 = arith.addf %479, %478 : vector<2x1xf32>
    %481 = arith.divf %479, %480 : vector<2x1xf32>
    %c0_214 = arith.constant 0 : index
    %c0_215 = arith.constant 0 : index
    %482 = vector.load %arg8[%c0_214, %c0_215] : memref<2x1xf32, #tpu.memory_space<vmem>>, vector<2x1xf32>
    tpu.vector_store %arg8[%c0_214, %c0_215], %481 {strides = array<i32>} : memref<2x1xf32, #tpu.memory_space<vmem>>, vector<2x1xf32>,
    return
  }
}

</mosaic_0001>

<bundles_post_ra>
// kernel: tpu_custom_call.1
= control target key start
LH: loop header
LB: loop body
LE: loop exit
PB: predicated region body
PF: predicated region fallthrough
CT: control target
= control target key end

     0   :  { %s3260_s0 = inlined_call_operand.hbm [shape: f32[16,16], index: 0, kind: input, shape index: {}]   ;;  %s3261_s1 = inlined_call_operand.hbm [shape: f32[16,256], index: 1, kind: input, shape index: {}]   ;;  %s3262_s2 = inlined_call_operand.hbm [shape: f32[64,256], index: 2, kind: input, shape index: {}]   ;;  %s3263_s3 = inlined_call_operand.vmem [shape: f32[1,256], index: 3, kind: input, shape index: {}]   ;;  %s3264_s4 = inlined_call_operand.hbm [shape: f32[128,256], index: 4, kind: input, shape index: {}]   ;;  %s3265_s5 = inlined_call_operand.vmem [shape: f32[1,256], index: 5, kind: input, shape index: {}]   ;;  %s3266_s6 = inlined_call_operand.vmem [shape: f32[1,64], index: 6, kind: input, shape index: {}]   ;;  %s3267_s7 = inlined_call_operand.<no memory space> [shape: f32[1,1], index: 7, kind: input, shape index: {}]   ;;  %s3268_s8 = inlined_call_operand.vmem [shape: f32[2,1], index: 8, kind: output, shape index: {}]  }
   0x1   :  { %v13_v0 = vstv %s3267_s7 }
   0x2   :  { %14 = vst [vmem:[#allocation3] sm:$0x1] %v13_v0 }
   0x3   :  { %15 = vsyncpa [#allocation5], 0 }
   0x4   :  { %16 = vsyncpa [#allocation7], 0 }
   0x5   :  { %17 = vsyncpa [#allocation10], 0  ;;  %s2662_s29 = smov [#allocation6]   ;;  %s2568_s11 = scalar_lea.hbm %s3261_s1, 512 }
   0x6   :  { %s35_s30 = sshll.u32 %s2662_s29, 4  ;;  %p2569_p0 = scmp.ne.s32.totalorder %s3261_s1, %s2568_s11  ;;  %s36_s30 = int_to_ptr.vmem [resolvable:$true] %s35_s30 }
   0x7   :  { %p2572_p1 = scmp.lt.u32.totalorder %s2568_s11, %s3261_s1 }
   0x9   :  { %p2574_p2 = pnand %p2572_p1, %p2569_p0 }
   0xb   :  { %2577 = shalt.err (!%p2574_p2)
}
   0xc   :  { %s2578_s7 = scalar_lea.vmem %s36_s30, 512  ;;  %p2583_p4 = scmp.lt.s32.totalorder %s36_s30, %s36_s30 }
   0xd   :  { %p2579_p3 = scmp.ne.s32.totalorder %s36_s30, %s2578_s7  ;;  %p2584_p5 = scmp.lt.s32.totalorder %s2578_s7, %s2578_s7 }
   0xf   :  { %p2585_p6 = por %p2584_p5, %p2583_p4 }
  0x11   :  { %p2586_p7 = pnand %p2585_p6, %p2579_p3 }
  0x13   :  { %2589 = shalt.err (!%p2586_p7)
}
  0x14   :  { %s2663_s16 = smov 256   ;;  %s2664_s17 = smov 16  }
  0x15   :  { %41 = dma.hbm_to_vmem [thread:$0]  %s3261_s1, 512, %s36_s30, [#allocation7], %s2663_s16, %s2663_s16, %s2664_s17  }
  0x16   :  { %s2665_s20 = smov [#allocation4]   ;;  %s2590_s24 = scalar_lea.hbm %s3260_s0, 256 }
  0x17   :  { %s23_s21 = sshll.u32 %s2665_s20, 4  ;;  %p2591_p8 = scmp.ne.s32.totalorder %s3260_s0, %s2590_s24  ;;  %s24_s21 = int_to_ptr.vmem [resolvable:$true] %s23_s21 }
  0x18   :  { %p2594_p9 = scmp.lt.u32.totalorder %s2590_s24, %s3260_s0 }
  0x1a   :  { %p2596_p10 = pnand %p2594_p9, %p2591_p8 }
  0x1c   :  { %2599 = shalt.err (!%p2596_p10)
}
  0x1d   :  { %s2600_s29 = scalar_lea.vmem %s24_s21, 256  ;;  %p2605_p12 = scmp.lt.s32.totalorder %s24_s21, %s24_s21 }
  0x1e   :  { %p2601_p11 = scmp.ne.s32.totalorder %s24_s21, %s2600_s29  ;;  %p2606_p13 = scmp.lt.s32.totalorder %s2600_s29, %s2600_s29 }
  0x20   :  { %p2607_p0 = por %p2606_p13, %p2605_p12 }
  0x22   :  { %p2608_p1 = pnand %p2607_p0, %p2601_p11 }
  0x24   :  { %2611 = shalt.err (!%p2608_p1)
}
  0x25   :  { %s2666_s1 = smov 128   ;;  %s2667_s30 = smov 8  }
  0x26   :  { %29 = dma.hbm_to_vmem [thread:$0]  %s3260_s0, 256, %s24_s21, [#allocation5], %s2666_s1, %s2666_s1, %s2667_s30  }
  0x27   :  { %s2668_s11 = smov [#allocation8]   ;;  %s2669_s13 = smov [#allocation9]  }
  0x28   :  { %s47_s12 = sshll.u32 %s2668_s11, 4  ;;  %s61_s14 = sshll.u32 %s2669_s13, 4  ;;  %s48_s12 = int_to_ptr.vmem [resolvable:$true] %s47_s12  ;;  %s2747_s14 = int_to_ptr.vmem [resolvable:$true] %s61_s14 }
  0x29   :  { %s2612_s18 = scalar_lea.hbm %s3262_s2, 2048 }
  0x2a   :  { %p2613_p2 = scmp.ne.s32.totalorder %s3262_s2, %s2612_s18  ;;  %p2616_p3 = scmp.lt.u32.totalorder %s2612_s18, %s3262_s2 }
  0x2c   :  { %p2618_p4 = pnand %p2616_p3, %p2613_p2 }
  0x2e   :  { %2621 = shalt.err (!%p2618_p4)
}
  0x2f   :  { %s2622_s0 = scalar_lea.vmem %s48_s12, 2048  ;;  %p2627_p6 = scmp.lt.s32.totalorder %s48_s12, %s48_s12 }
  0x30   :  { %p2623_p5 = scmp.ne.s32.totalorder %s48_s12, %s2622_s0  ;;  %p2628_p7 = scmp.lt.s32.totalorder %s2622_s0, %s2622_s0 }
  0x32   :  { %p2629_p8 = por %p2628_p7, %p2627_p6 }
  0x34   :  { %p2630_p9 = pnand %p2629_p8, %p2623_p5 }
  0x36   :  { %2633 = shalt.err (!%p2630_p9)
}
  0x37   :  { %53 = dma.hbm_to_vmem [thread:$0]  %s3262_s2, 2048, %s48_s12, [#allocation7], %s2663_s16, %s2663_s16, %s2664_s17  }
  0x38   :  { %s2634_s27 = scalar_lea.hbm %s3264_s4, 4096 }
  0x39   :  { %p2635_p10 = scmp.ne.s32.totalorder %s3264_s4, %s2634_s27  ;;  %p2638_p11 = scmp.lt.u32.totalorder %s2634_s27, %s3264_s4 }
  0x3b   :  { %p2640_p12 = pnand %p2638_p11, %p2635_p10 }
  0x3d   :  { %2643 = shalt.err (!%p2640_p12)
}
  0x3e   :  { %s2644_s9 = scalar_lea.vmem %s2747_s14, 4096  ;;  %p2649_p0 = scmp.lt.s32.totalorder %s2747_s14, %s2747_s14 }
  0x3f   :  { %p2645_p13 = scmp.ne.s32.totalorder %s2747_s14, %s2644_s9  ;;  %p2650_p1 = scmp.lt.s32.totalorder %s2644_s9, %s2644_s9 }
  0x41   :  { %p2651_p2 = por %p2650_p1, %p2649_p0 }
  0x43   :  { %p2652_p3 = pnand %p2651_p2, %p2645_p13 }
  0x45   :  { %2655 = shalt.err (!%p2652_p3)
}
  0x46   :  { %67 = dma.hbm_to_vmem [thread:$0]  %s3264_s4, 4096, %s2747_s14, [#allocation10], %s2663_s16, %s2663_s16, %s2664_s17  }
  0x47   :  { %2656 = dma.done.wait [#allocation5], 256  }
  0x48   :  { %2657 = vsyncadd [#allocation5], 4294967040 }
  0x49   :  { %2658 = dma.done.wait [#allocation7], 2560  }
  0x4a   :  { %2659 = vsyncadd [#allocation7], 4294964736 }
  0x4b   :  { %2660 = dma.done.wait [#allocation10], 4096  }
  0x4c   :  { %2661 = vsyncadd [#allocation10], 4294963200  ;;  %v2670_v1 = vmov 0.0   ;;  %v89_v2 = vld [vmem:[#allocation6 + $0x8] sm:$0xff]  ;;  %v91_v3 = vld [vmem:[#allocation6 + $0x18] sm:$0xff]  ;;  %vm104_vm0 = vcmask 130048   ;;  %v94_v9 = vlaneseq }
  0x4d   :  { %175 = vmatprep.mubr.f32.mxu0 %v2670_v1  ;;  %550 = vmatprep.mubr.f32.mxu1 %v2670_v1  ;;  %v88_v4 = vld [vmem:[#allocation6] sm:$0xff]  ;;  %v2102_v5 = vpack.c.bf16 %v91_v3, %v89_v2  ;;  %v90_v6 = vld [vmem:[#allocation6 + $0x10] sm:$0xff]  ;;  %v92_v12 = vld [vmem:[%s3263_s3] sm:$0x3]  ;;  %s2671_s3 = smov 64   ;;  %vm221_vm1 = vcmask 517120  }
  0x4e   :  { %v2104_v7 = vpack.c.bf16 %v90_v6, %v88_v4  ;;  %v86_v8 = vld [vmem:[#allocation4] sm:$0xff]  ;;  %v2788_v10 = vshrl.u32 %v94_v9, 7  ;;  %v224_v27 = vld [vmem:[#allocation9 + $0x8] sm:$0xff]  ;;  %v226_v28 = vld [vmem:[#allocation9 + $0x18] sm:$0xff]  ;;  %vm239_vm2 = vcmask 523264   ;;  %vm330_vm3 = vcmask 1041920  }
  0x4f   :  { %2103 = vmatprep.subr.bf16.mxu0 %v2102_v5  ;;  %v223_v29 = vld [vmem:[#allocation9] sm:$0xff]  ;;  %v2812_v30 = vpack.c.bf16 %v226_v28, %v224_v27  ;;  %v225_v31 = vld [vmem:[#allocation9 + $0x10] sm:$0xff]  ;;  %v228_v32 = vld [vmem:[#allocation9 + $0x28] sm:$0xff]  ;;  %vm451_vm4 = vcmask 519170   ;;  %vm699_vm5 = vcmask 521220   ;;  %vm947_vm6 = vcmask 523270  }
  0x50   :  { %2105 = vmatpush1.bf16.msra.mxu0 %v2104_v7  ;;  %v96_v11 = vsub.s32 0, %v2788_v10  ;;  %v100_v13 = vsub.s32 1, %v2788_v10  ;;  %v230_v33 = vld [vmem:[#allocation9 + $0x38] sm:$0xff]  ;;  %v2814_v34 = vpack.c.bf16 %v225_v31, %v223_v29  ;;  %v227_v36 = vld [vmem:[#allocation9 + $0x20] sm:$0xff]  ;;  %v229_v37 = vld [vmem:[#allocation9 + $0x30] sm:$0xff]  ;;  %vm2080_vm7 = vcmask 1024  }
  0x51   :  { %v2816_v35 = vpack.c.bf16 %v230_v33, %v228_v32  ;;  %v232_v38 = vld [vmem:[#allocation9 + $0x48] sm:$0xff]  ;;  %2107 = vmatprep.subr.bf16.mxu0 %v2812_v30  ;;  %v234_v39 = vld [vmem:[#allocation9 + $0x58] sm:$0xff]  ;;  %2139 = vmatprep.subr.bf16.mxu1 %v2812_v30  ;;  %v2821_v40 = vpack.c.bf16 %v229_v37, %v227_v36  ;;  %v231_v43 = vld [vmem:[#allocation9 + $0x40] sm:$0xff] }
  0x52   :  { %v2797_v14 = vrot.slane %v92_v12, %v96_v11  ;;  %v2801_v15 = vrot.slane %v92_v12, %v100_v13  ;;  %v87_v41 = vld [vmem:[#allocation4 + $0x8] sm:$0xff]  ;;  %2141 = vmatpush1.bf16.msra.mxu1 %v2814_v34  ;;  %v2825_v42 = vpack.c.bf16 %v234_v39, %v232_v38  ;;  %v233_v44 = vld [vmem:[#allocation9 + $0x50] sm:$0xff]  ;;  %v236_v45 = vld [vmem:[#allocation9 + $0x68] sm:$0xff] }
  0x53   :  { %2089 = vmatmul.mubr.msk.f32.vlgmr.msra.gmra.mrb[0].mxu0 %vm104_vm0, %v86_v8  ;;  %v238_v46 = vld [vmem:[#allocation9 + $0x78] sm:$0xff]  ;;  %2143 = vmatprep.subr.bf16.mxu1 %v2816_v35  ;;  %v2831_v47 = vpack.c.bf16 %v233_v44, %v231_v43  ;;  %v235_v49 = vld [vmem:[#allocation9 + $0x60] sm:$0xff]  ;;  %v237_v50 = vld [vmem:[#allocation9 + $0x70] sm:$0xff] }
  0x54   :  { %181 = vmatprep.mubr.f32.mxu0 %v2670_v1  ;;  %2109 = vmatpush1.bf16.msra.mxu0 %v2814_v34  ;;  %v2835_v48 = vpack.c.bf16 %v238_v46, %v236_v45  ;;  %v333_v51 = vld [vmem:[#allocation8 + $0x8] sm:$0xff]  ;;  %v335_v52 = vld [vmem:[#allocation8 + $0x18] sm:$0xff]  ;;  %v2839_v53 = vpack.c.bf16 %v237_v50, %v235_v49  ;;  %v332_v0 = vld [vmem:[#allocation8] sm:$0xff] }
  0x55   :  { %2111 = vmatprep.subr.bf16.mxu0 %v2816_v35  ;;  %v2843_v54 = vpack.c.bf16 %v335_v52, %v333_v51  ;;  %v334_v2 = vld [vmem:[#allocation8 + $0x10] sm:$0xff]  ;;  %v337_v3 = vld [vmem:[#allocation8 + $0x28] sm:$0xff]  ;;  %v339_v4 = vld [vmem:[#allocation8 + $0x38] sm:$0xff] }
  0x56   :  { %2145 = vmatpush1.bf16.msra.mxu1 %v2821_v40  ;;  %v2857_v5 = vpack.c.bf16 %v334_v2, %v332_v0  ;;  %v2859_v6 = vpack.c.bf16 %v339_v4, %v337_v3  ;;  %v336_v7 = vld [vmem:[#allocation8 + $0x20] sm:$0xff]  ;;  %v338_v8 = vld [vmem:[#allocation8 + $0x30] sm:$0xff]  ;;  %v341_v12 = vld [vmem:[#allocation8 + $0x48] sm:$0xff] }
  0x57   :  { %2090 = vmatmul.mubr.msk.f32.gmra.mrb[2].mxu0 %vm104_vm0, %v87_v41  ;;  %2147 = vmatprep.subr.bf16.mxu1 %v2825_v42  ;;  %v344_v27 = vld [vmem:[#allocation8 + $0x60] sm:$0xff]  ;;  %v346_v28 = vld [vmem:[#allocation8 + $0x70] sm:$0xff]  ;;  %v188_v31 = vld [vmem:[%s3265_s5] sm:$0x3] }
  0x58   :  { %306 = vmatprep.mubr.f32.mxu0 %v2670_v1  ;;  %2113 = vmatpush1.bf16.msra.mxu0 %v2821_v40  ;;  %v2877_v29 = vpack.c.bf16 %v346_v28, %v344_v27  ;;  %v2897_v32 = vrot.slane %v188_v31, %v96_v11  ;;  %v2901_v33 = vrot.slane %v188_v31, %v100_v13 }
  0x59   :  { %2115 = vmatprep.subr.bf16.mxu0 %v2825_v42 }
  0x5a   :  { %2149 = vmatpush1.bf16.msra.mxu1 %v2831_v47 }
  0x5b   :  { %2151 = vmatprep.subr.bf16.mxu1 %v2835_v48 }
  0x5c   :  { %2117 = vmatpush1.bf16.msra.mxu0 %v2831_v47 }
  0x5d   :  { %2119 = vmatprep.subr.bf16.mxu0 %v2835_v48 }
  0x5e   :  { %2153 = vmatpush1.bf16.msra.mxu1 %v2839_v53 }
  0x60   :  { %2121 = vmatpush1.bf16.msra.mxu0 %v2839_v53 }
  0x61   :  { %2123 = vmatprep.subr.bf16.mxu0 %v2843_v54 }
 0x126   :  { %v177_v16 = vpop.f32.mrb[0].mxu0 }
 0x127   :  { %v2804_v17 = vadd.f32 %v177_v16, %v2797_v14  ;;  %v179_v18 = vpop.f32.mrb[1].mxu0  ;;  %v343_v16 = vld [vmem:[#allocation8 + $0x58] sm:$0xff] }
 0x128   :  { %v2807_v19 = vadd.f32 %v179_v18, %v2801_v15  ;;  %v2864_v18 = vpack.c.bf16 %v338_v8, %v336_v7 }
 0x129   :  { %v200_v20 = vmul.f32 0.5, %v2804_v17 }
 0x12a   :  { %v201_v21 = vmul.f32 0.5, %v2807_v19  ;;  %v2853_v62 = vpop.f32.mrb[2].mxu0 }
 0x12b   :  { %2468 = vtanh.f32 %v200_v20  ;;  %v2855_v63 = vpop.f32.mrb[3].mxu0  ;;  %v2868_v20 = vpack.c.bf16 %v343_v16, %v341_v12 }
 0x12c   :  { %2470 = vtanh.f32 %v201_v21  ;;  %v340_v21 = vld [vmem:[#allocation8 + $0x40] sm:$0xff] }
 0x135   :  { %v2469_v22 = vpop.eup %2468 }
 0x136   :  { %v204_v23 = vmul.f32 0.5, %v2469_v22  ;;  %v2471_v25 = vpop.eup %2470  ;;  %v342_v22 = vld [vmem:[#allocation8 + $0x50] sm:$0xff] }
 0x137   :  { %v206_v58 = vmul.f32 0.5, %v2471_v25 }
 0x138   :  { %v205_v24 = vadd.f32 0.5, %v204_v23  ;;  %v345_v23 = vld [vmem:[#allocation8 + $0x68] sm:$0xff] }
 0x139   :  { %v207_v59 = vadd.f32 0.5, %v206_v58 }
 0x13a   :  { %v209_v26 = vmul.f32 %v2471_v25, %v205_v24  ;;  %v208_v55 = vmul.f32 0.0, %v205_v24  ;;  %v347_v24 = vld [vmem:[#allocation8 + $0x78] sm:$0xff]  ;;  %v2871_v25 = vpack.c.bf16 %v342_v22, %v340_v21 }
 0x13c   :  { %211 = vrot.lane.b32.xlu0 %v209_v26, %s2671_s3  ;;  %v2874_v26 = vpack.c.bf16 %v347_v24, %v345_v23 }
 0x1ae   :  { %v212_v56 = vpop.permute.xlu0 %211 }
 0x1af   :  { %v2849_v57 = vadd.f32 %v212_v56, %v208_v55 }
 0x1b1   :  { %2472 = vtanh.f32 %v2849_v57 }
 0x1bb   :  { %v2473_v60 = vpop.eup %2472 }
 0x1bc   :  { %v216_v61 = vmul.f32 %v2473_v60, %v207_v59 }
 0x1be   :  { %218 = vrot.lane.b32.xlu0 %v216_v61, %s2671_s3  ;;  %v436_v61 = vrot.slane %v2849_v57, 6 }
 0x230   :  { %v219_v9 = vpop.permute.xlu0 %218 }
 0x231   :  { %222 = vst.msk [vmem:[#allocation2] sm:$0x3] %vm221_vm1, %v219_v9  ;;  %2091 = vmatmul.mubr.msk.f32.vlgmr.msra.gmra.mrb[4].mxu0 %vm239_vm2, %v219_v9 }
 0x232   :  { %2125 = vmatpush1.bf16.msra.mxu0 %v2857_v5  ;;  %412 = vmatprep.mubr.f32.mxu0 %v2670_v1 }
 0x233   :  { %2127 = vmatprep.subr.bf16.mxu0 %v2859_v6 }
 0x236   :  { %2129 = vmatpush1.bf16.msra.mxu0 %v2864_v18 }
 0x237   :  { %2131 = vmatprep.subr.bf16.mxu0 %v2868_v20 }
 0x23a   :  { %2133 = vmatpush1.bf16.msra.mxu0 %v2871_v25 }
 0x23b   :  { %2135 = vmatprep.subr.bf16.mxu0 %v2874_v26 }
 0x23e   :  { %2137 = vmatpush1.bf16.msra.mxu0 %v2877_v29 }
 0x23f   :  { %2171 = vmatprep.subr.bf16.mxu0 %v2843_v54 }
 0x241   :  { %2092 = vmatmul.mubr.msk.f32.vlgmr.msra.gmra.mrb[6].mxu0 %vm239_vm2, %v219_v9 }
 0x242   :  { %2173 = vmatpush1.bf16.msra.mxu0 %v2857_v5  ;;  %660 = vmatprep.mubr.f32.mxu0 %v2670_v1 }
 0x243   :  { %2175 = vmatprep.subr.bf16.mxu0 %v2859_v6 }
 0x246   :  { %2177 = vmatpush1.bf16.msra.mxu0 %v2864_v18 }
 0x247   :  { %2179 = vmatprep.subr.bf16.mxu0 %v2868_v20 }
 0x24a   :  { %2181 = vmatpush1.bf16.msra.mxu0 %v2871_v25 }
 0x24b   :  { %2183 = vmatprep.subr.bf16.mxu0 %v2874_v26 }
 0x24e   :  { %2185 = vmatpush1.bf16.msra.mxu0 %v2877_v29 }
 0x24f   :  { %2187 = vmatprep.subr.bf16.mxu0 %v2812_v30 }
 0x304   :  { %v308_v36 = vpop.f32.mrb[4].mxu0 }
 0x305   :  { %v309_v37 = vadd.f32 %v308_v36, %v2897_v32  ;;  %v310_v38 = vpop.f32.mrb[5].mxu0 }
 0x306   :  { %v311_v39 = vadd.f32 %v310_v38, %v2901_v33  ;;  %v471_v38 = vld [vmem:[#allocation9 + $0x88] sm:$0xff] }
 0x307   :  { %v313_v41 = vmul.f32 0.5, %v309_v37 }
 0x308   :  { %v314_v43 = vmul.f32 0.5, %v311_v39  ;;  %v473_v39 = vld [vmem:[#allocation9 + $0x98] sm:$0xff] }
 0x309   :  { %2474 = vtanh.f32 %v313_v41  ;;  %v470_v41 = vld [vmem:[#allocation9 + $0x80] sm:$0xff] }
 0x30a   :  { %2476 = vtanh.f32 %v314_v43  ;;  %v2930_v43 = vpack.c.bf16 %v473_v39, %v471_v38 }
 0x30c   :  { %2155 = vmatprep.subr.bf16.mxu1 %v2930_v43 }
 0x313   :  { %v2475_v44 = vpop.eup %2474 }
 0x314   :  { %v317_v45 = vmul.f32 0.5, %v2475_v44  ;;  %v414_v46 = vpop.f32.mrb[6].mxu0  ;;  %v2477_v10 = vpop.eup %2476  ;;  %v472_v44 = vld [vmem:[#allocation9 + $0x90] sm:$0xff] }
 0x315   :  { %v421_v49 = vrot.slane %v414_v46, 6  ;;  %v416_v11 = vpop.f32.mrb[7].mxu0  ;;  %v319_v28 = vmul.f32 0.5, %v2477_v10 }
 0x316   :  { %v318_v50 = vadd.f32 0.5, %v317_v45  ;;  %v422_v51 = vrot.slane %v416_v11, 6  ;;  %v2932_v45 = vpack.c.bf16 %v472_v44, %v470_v41 }
 0x317   :  { %v425_v13 = vadd.f32 %v421_v49, %v2804_v17  ;;  %v320_v31 = vadd.f32 0.5, %v319_v28 }
 0x318   :  { %v426_v52 = vadd.f32 %v422_v51, %v2807_v19  ;;  %v322_v55 = vmul.f32 %v2477_v10, %v318_v50  ;;  %v321_v23 = vmul.f32 0.0, %v318_v50  ;;  %2157 = vmatpush1.bf16.msra.mxu1 %v2932_v45 }
 0x319   :  { %v427_v56 = vmul.f32 0.5, %v425_v13 }
 0x31a   :  { %v428_v58 = vmul.f32 0.5, %v426_v52 }
 0x31b   :  { %2478 = vtanh.f32 %v427_v56  ;;  %v477_v56 = vld [vmem:[#allocation9 + $0xb8] sm:$0xff] }
 0x31c   :  { %2480 = vtanh.f32 %v428_v58 }
 0x325   :  { %v2479_v59 = vpop.eup %2478 }
 0x326   :  { %v431_v60 = vmul.f32 0.5, %v2479_v59  ;;  %v2481_v2 = vpop.eup %2480  ;;  %v474_v59 = vld [vmem:[#allocation9 + $0xa0] sm:$0xff] }
 0x327   :  { %v433_v9 = vmul.f32 0.5, %v2481_v2 }
 0x328   :  { %v432_v0 = vadd.f32 0.5, %v431_v60  ;;  %v476_v60 = vld [vmem:[#allocation9 + $0xb0] sm:$0xff] }
 0x329   :  { %v434_v12 = vadd.f32 0.5, %v433_v9 }
 0x32a   :  { %v439_v3 = vmul.f32 %v2481_v2, %v432_v0  ;;  %v438_v4 = vmul.f32 %v436_v61, %v432_v0  ;;  %v2942_v61 = vpack.c.bf16 %v476_v60, %v474_v59  ;;  %v479_v0 = vld [vmem:[#allocation9 + $0xc8] sm:$0xff]  ;;  %v481_v2 = vld [vmem:[#allocation9 + $0xd8] sm:$0xff] }
 0x32c   :  { %441 = vrot.lane.b32.xlu1 %v439_v3, %s2671_s3  ;;  %v2948_v3 = vpack.c.bf16 %v481_v2, %v479_v0 }
 0x39e   :  { %v442_v7 = vpop.permute.xlu1 %441 }
 0x39f   :  { %v2909_v8 = vadd.f32 %v442_v7, %v438_v4  ;;  %v478_v4 = vld [vmem:[#allocation9 + $0xc0] sm:$0xff]  ;;  %v480_v7 = vld [vmem:[#allocation9 + $0xd0] sm:$0xff] }
 0x3a0   :  { %v2950_v9 = vpack.c.bf16 %v480_v7, %v478_v4 }
 0x3a1   :  { %2482 = vtanh.f32 %v2909_v8 }
 0x3ab   :  { %v2483_v16 = vpop.eup %2482 }
 0x3ac   :  { %v2912_v21 = vmul.f32 %v2483_v16, %v434_v12  ;;  %v483_v12 = vld [vmem:[#allocation9 + $0xe8] sm:$0xff]  ;;  %v485_v16 = vld [vmem:[#allocation9 + $0xf8] sm:$0xff] }
 0x3ae   :  { %v591_v22 = vrot.slane %v2912_v21, 2 }
 0x3b0   :  { %592 = vrot.lane.b32.xlu1 %v591_v22, %s2671_s3 }
 0x3b4   :  { %324 = vrot.lane.b32.xlu1 %v322_v55, %s2671_s3  ;;  %v475_v55 = vld [vmem:[#allocation9 + $0xa8] sm:$0xff] }
 0x3b5   :  { %v2940_v58 = vpack.c.bf16 %v477_v56, %v475_v55 }
 0x3b7   :  { %2159 = vmatprep.subr.bf16.mxu1 %v2940_v58 }
 0x3b8   :  { %2161 = vmatpush1.bf16.msra.mxu1 %v2942_v61 }
 0x3b9   :  { %2163 = vmatprep.subr.bf16.mxu1 %v2948_v3 }
 0x3bc   :  { %2165 = vmatpush1.bf16.msra.mxu1 %v2950_v9 }
 0x422   :  { %v593_v57 = vpop.permute.xlu1 %592 }
 0x423   :  { %2093 = vmatmul.mubr.msk.f32.vlgmr.msra.gmra.mrb[8].mxu0 %vm239_vm2, %v593_v57  ;;  %v2956_v57 = vpack.c.bf16 %v485_v16, %v483_v12 }
 0x424   :  { %2189 = vmatpush1.bf16.msra.mxu0 %v2814_v34  ;;  %798 = vmatprep.mubr.f32.mxu0 %v2670_v1 }
 0x425   :  { %2191 = vmatprep.subr.bf16.mxu0 %v2816_v35  ;;  %2167 = vmatprep.subr.bf16.mxu1 %v2956_v57 }
 0x426   :  { %v325_v24 = vpop.permute.xlu1 %324 }
 0x427   :  { %v2921_v27 = vadd.f32 %v325_v24, %v321_v23  ;;  %v482_v23 = vld [vmem:[#allocation9 + $0xe0] sm:$0xff]  ;;  %v484_v24 = vld [vmem:[#allocation9 + $0xf0] sm:$0xff] }
 0x428   :  { %2193 = vmatpush1.bf16.msra.mxu0 %v2821_v40 }
 0x429   :  { %2484 = vtanh.f32 %v2921_v27  ;;  %2195 = vmatprep.subr.bf16.mxu0 %v2825_v42 }
 0x42c   :  { %2197 = vmatpush1.bf16.msra.mxu0 %v2831_v47 }
 0x42d   :  { %2199 = vmatprep.subr.bf16.mxu0 %v2835_v48 }
 0x430   :  { %2201 = vmatpush1.bf16.msra.mxu0 %v2839_v53 }
 0x431   :  { %2203 = vmatprep.subr.bf16.mxu0 %v2930_v43 }
 0x433   :  { %v2485_v36 = vpop.eup %2484 }
 0x434   :  { %v329_v37 = vmul.f32 %v2485_v36, %v320_v31  ;;  %2205 = vmatpush1.bf16.msra.mxu0 %v2932_v45  ;;  %v2958_v31 = vpack.c.bf16 %v484_v24, %v482_v23  ;;  %v684_v36 = vrot.slane %v2909_v8, 6 }
 0x435   :  { %2207 = vmatprep.subr.bf16.mxu0 %v2940_v58 }
 0x436   :  { %331 = vst.msk [vmem:[#allocation2] sm:$0x3] %vm330_vm3, %v329_v37  ;;  %2169 = vmatpush1.bf16.msra.mxu1 %v2958_v31 }
 0x437   :  { %2219 = vmatprep.subr.bf16.mxu1 %v2843_v54 }
 0x438   :  { %2209 = vmatpush1.bf16.msra.mxu0 %v2942_v61 }
 0x439   :  { %2211 = vmatprep.subr.bf16.mxu0 %v2948_v3 }
 0x43c   :  { %2213 = vmatpush1.bf16.msra.mxu0 %v2950_v9 }
 0x43d   :  { %2215 = vmatprep.subr.bf16.mxu0 %v2956_v57 }
 0x440   :  { %2217 = vmatpush1.bf16.msra.mxu0 %v2958_v31 }
 0x441   :  { %2267 = vmatprep.subr.bf16.mxu0 %v2843_v54 }
 0x4f6   :  { %v662_v46 = vpop.f32.mrb[8].mxu0 }
 0x4f7   :  { %v669_v49 = vrot.slane %v662_v46, 4  ;;  %v664_v11 = vpop.f32.mrb[9].mxu0 }
 0x4f8   :  { %v670_v50 = vrot.slane %v664_v11, 4 }
 0x4f9   :  { %v673_v51 = vadd.f32 %v669_v49, %v2804_v17 }
 0x4fa   :  { %v674_v10 = vadd.f32 %v670_v50, %v2807_v19 }
 0x4fb   :  { %v675_v13 = vmul.f32 0.5, %v673_v51 }
 0x4fc   :  { %v676_v52 = vmul.f32 0.5, %v674_v10 }
 0x4fd   :  { %2486 = vtanh.f32 %v675_v13 }
 0x4fe   :  { %2488 = vtanh.f32 %v676_v52 }
 0x507   :  { %v2487_v22 = vpop.eup %2486 }
 0x508   :  { %v679_v28 = vmul.f32 0.5, %v2487_v22  ;;  %v2489_v38 = vpop.eup %2488 }
 0x509   :  { %v681_v49 = vmul.f32 0.5, %v2489_v38 }
 0x50a   :  { %v680_v37 = vadd.f32 0.5, %v679_v28 }
 0x50b   :  { %v682_v50 = vadd.f32 0.5, %v681_v49 }
 0x50c   :  { %v687_v39 = vmul.f32 %v2489_v38, %v680_v37  ;;  %v686_v41 = vmul.f32 %v684_v36, %v680_v37 }
 0x50e   :  { %689 = vrot.lane.b32.xlu0 %v687_v39, %s2671_s3 }
 0x512   :  { %448 = vrot.lane.b32.xlu0 %v2912_v21, %s2671_s3 }
 0x580   :  { %v690_v44 = vpop.permute.xlu0 %689 }
 0x581   :  { %v2970_v46 = vadd.f32 %v690_v44, %v686_v41 }
 0x583   :  { %2490 = vtanh.f32 %v2970_v46  ;;  %v932_v36 = vrot.slane %v2970_v46, 6 }
 0x584   :  { %v449_v8 = vpop.permute.xlu0 %448 }
 0x585   :  { %452 = vst.msk [vmem:[#allocation2 - $0x2] sm:$0xc] %vm451_vm4, %v449_v8 }
 0x58c   :  { %v453_v11 = vld [vmem:[#allocation2] sm:$0x3] }
 0x58d   :  { %v2491_v54 = vpop.eup %2490  ;;  %551 = vmatmul.mubr.f32.vlgmr.msra.gmra.mrb[0].mxu1 %v453_v11 }
 0x58e   :  { %v694_v51 = vmul.f32 %v2491_v54, %v682_v50  ;;  %2221 = vmatpush1.bf16.msra.mxu1 %v2857_v5  ;;  %908 = vmatprep.mubr.f32.mxu1 %v2670_v1 }
 0x58f   :  { %2223 = vmatprep.subr.bf16.mxu1 %v2859_v6 }
 0x590   :  { %v839_v21 = vrot.slane %v694_v51, 4 }
 0x592   :  { %840 = vrot.lane.b32.xlu1 %v839_v21, %s2671_s3  ;;  %2225 = vmatpush1.bf16.msra.mxu1 %v2864_v18 }
 0x593   :  { %2227 = vmatprep.subr.bf16.mxu1 %v2868_v20 }
 0x596   :  { %696 = vrot.lane.b32.xlu1 %v694_v51, %s2671_s3  ;;  %2229 = vmatpush1.bf16.msra.mxu1 %v2871_v25 }
 0x597   :  { %2231 = vmatprep.subr.bf16.mxu1 %v2874_v26 }
 0x59a   :  { %2233 = vmatpush1.bf16.msra.mxu1 %v2877_v29 }
 0x59b   :  { %2235 = vmatprep.subr.bf16.mxu1 %v2812_v30 }
 0x604   :  { %v841_v10 = vpop.permute.xlu1 %840 }
 0x605   :  { %2094 = vmatmul.mubr.msk.f32.vlgmr.msra.gmra.mrb[2].mxu1 %vm239_vm2, %v841_v10 }
 0x606   :  { %2237 = vmatpush1.bf16.msra.mxu1 %v2814_v34  ;;  %1046 = vmatprep.mubr.f32.mxu1 %v2670_v1 }
 0x607   :  { %2239 = vmatprep.subr.bf16.mxu1 %v2816_v35 }
 0x608   :  { %v697_v49 = vpop.permute.xlu1 %696 }
 0x60a   :  { %2241 = vmatpush1.bf16.msra.mxu1 %v2821_v40 }
 0x60b   :  { %2243 = vmatprep.subr.bf16.mxu1 %v2825_v42 }
 0x60e   :  { %2245 = vmatpush1.bf16.msra.mxu1 %v2831_v47 }
 0x60f   :  { %2247 = vmatprep.subr.bf16.mxu1 %v2835_v48 }
 0x612   :  { %2249 = vmatpush1.bf16.msra.mxu1 %v2839_v53 }
 0x613   :  { %2251 = vmatprep.subr.bf16.mxu1 %v2930_v43 }
 0x616   :  { %2253 = vmatpush1.bf16.msra.mxu1 %v2932_v45 }
 0x617   :  { %2255 = vmatprep.subr.bf16.mxu1 %v2940_v58 }
 0x61a   :  { %2257 = vmatpush1.bf16.msra.mxu1 %v2942_v61 }
 0x61b   :  { %2259 = vmatprep.subr.bf16.mxu1 %v2948_v3 }
 0x61e   :  { %2261 = vmatpush1.bf16.msra.mxu1 %v2950_v9 }
 0x61f   :  { %2263 = vmatprep.subr.bf16.mxu1 %v2956_v57 }
 0x622   :  { %2265 = vmatpush1.bf16.msra.mxu1 %v2958_v31 }
 0x660   :  { %v552_v30 = vpop.f32.mrb[0].mxu1 }
 0x661   :  { %v553_v34 = vadd.f32 %v552_v30, %v2897_v32  ;;  %v554_v35 = vpop.f32.mrb[1].mxu1 }
 0x662   :  { %v555_v40 = vadd.f32 %v554_v35, %v2901_v33 }
 0x663   :  { %v557_v42 = vmul.f32 0.5, %v553_v34 }
 0x664   :  { %v558_v47 = vmul.f32 0.5, %v555_v40 }
 0x665   :  { %2492 = vtanh.f32 %v557_v42 }
 0x666   :  { %2494 = vtanh.f32 %v558_v47 }
 0x66f   :  { %v2493_v48 = vpop.eup %2492 }
 0x670   :  { %v561_v53 = vmul.f32 0.5, %v2493_v48  ;;  %v2495_v52 = vpop.eup %2494 }
 0x672   :  { %v562_v13 = vadd.f32 0.5, %v561_v53 }
 0x674   :  { %v566_v55 = vmul.f32 %v2495_v52, %v562_v13  ;;  %v565_v16 = vmul.f32 %v562_v13, %v2921_v27 }
 0x676   :  { %568 = vrot.lane.b32.xlu0 %v566_v55, %s2671_s3 }
 0x6d8   :  { %v910_v56 = vpop.f32.mrb[2].mxu1 }
 0x6d9   :  { %v917_v59 = vrot.slane %v910_v56, 2  ;;  %v912_v60 = vpop.f32.mrb[3].mxu1 }
 0x6da   :  { %v918_v0 = vrot.slane %v912_v60, 2 }
 0x6db   :  { %v921_v2 = vadd.f32 %v917_v59, %v2804_v17  ;;  %v563_v17 = vmul.f32 0.5, %v2495_v52 }
 0x6dc   :  { %v922_v4 = vadd.f32 %v918_v0, %v2807_v19  ;;  %v3035_v0 = vadd.f32 %v2853_v62, %v2797_v14 }
 0x6dd   :  { %v923_v7 = vmul.f32 0.5, %v921_v2  ;;  %v564_v19 = vadd.f32 0.5, %v563_v17  ;;  %v3039_v2 = vadd.f32 %v2855_v63, %v2801_v15  ;;  %v1313_v15 = vld [vmem:[#allocation8 + $0x8] sm:$0xff]  ;;  %v1315_v63 = vld [vmem:[#allocation8 + $0x18] sm:$0xff]  ;;  %v1314_v17 = vld [vmem:[#allocation8 + $0x10] sm:$0xff] }
 0x6de   :  { %v924_v12 = vmul.f32 0.5, %v922_v4 }
 0x6df   :  { %2496 = vtanh.f32 %v923_v7 }
 0x6e0   :  { %2498 = vtanh.f32 %v924_v12 }
 0x6e8   :  { %v569_v22 = vpop.permute.xlu0 %568 }
 0x6e9   :  { %v2497_v23 = vpop.eup %2496  ;;  %v571_v24 = vadd.f32 %v569_v22, %v565_v16 }
 0x6ea   :  { %v927_v28 = vmul.f32 0.5, %v2497_v23  ;;  %v2499_v38 = vpop.eup %2498 }
 0x6eb   :  { %2500 = vtanh.f32 %v571_v24  ;;  %v929_v50 = vmul.f32 0.5, %v2499_v38 }
 0x6ec   :  { %v928_v37 = vadd.f32 0.5, %v927_v28 }
 0x6ed   :  { %v930_v54 = vadd.f32 0.5, %v929_v50  ;;  %v1323_v50 = vld [vmem:[#allocation8 + $0x58] sm:$0xff] }
 0x6ee   :  { %v935_v39 = vmul.f32 %v2499_v38, %v928_v37  ;;  %v934_v41 = vmul.f32 %v932_v36, %v928_v37 }
 0x6f0   :  { %937 = vrot.lane.b32.xlu0 %v935_v39, %s2671_s3  ;;  %v1312_v39 = vld [vmem:[#allocation8] sm:$0xff] }
 0x6f5   :  { %v2501_v44 = vpop.eup %2500 }
 0x6f6   :  { %v573_v8 = vmul.f32 %v2501_v44, %v564_v19  ;;  %v1317_v19 = vld [vmem:[#allocation8 + $0x28] sm:$0xff]  ;;  %v1319_v44 = vld [vmem:[#allocation8 + $0x38] sm:$0xff] }
 0x6f8   :  { %574 = vst.msk [vmem:[#allocation2] sm:$0x3] %vm330_vm3, %v573_v8  ;;  %v3046_v8 = vpack.c.bf16 %v1314_v17, %v1312_v39  ;;  %v1201_v39 = vld [vmem:[#allocation9 + $0x50] sm:$0xff] }
 0x6f9   :  { %700 = vst.msk [vmem:[#allocation2 - $0x4] sm:$0x30] %vm699_vm5, %v697_v49  ;;  %v3048_v49 = vpack.c.bf16 %v1319_v44, %v1317_v19  ;;  %v1206_v44 = vld [vmem:[#allocation9 + $0x78] sm:$0xff] }
 0x700   :  { %v701_v27 = vld [vmem:[#allocation2] sm:$0x3] }
 0x701   :  { %799 = vmatmul.mubr.f32.vlgmr.msra.gmra.mrb[10].mxu0 %v701_v27  ;;  %v1316_v27 = vld [vmem:[#allocation8 + $0x20] sm:$0xff] }
 0x702   :  { %2269 = vmatpush1.bf16.msra.mxu0 %v2857_v5  ;;  %1156 = vmatprep.mubr.f32.mxu0 %v2670_v1 }
 0x703   :  { %2271 = vmatprep.subr.bf16.mxu0 %v2859_v6 }
 0x706   :  { %2273 = vmatpush1.bf16.msra.mxu0 %v2864_v18 }
 0x707   :  { %2275 = vmatprep.subr.bf16.mxu0 %v2868_v20 }
 0x70a   :  { %2277 = vmatpush1.bf16.msra.mxu0 %v2871_v25 }
 0x70b   :  { %2279 = vmatprep.subr.bf16.mxu0 %v2874_v26 }
 0x70e   :  { %2281 = vmatpush1.bf16.msra.mxu0 %v2877_v29 }
 0x762   :  { %v938_v46 = vpop.permute.xlu0 %937 }
 0x763   :  { %v940_v11 = vadd.f32 %v938_v46, %v934_v41  ;;  %v3044_v41 = vpack.c.bf16 %v1315_v63, %v1313_v15  ;;  %v1318_v46 = vld [vmem:[#allocation8 + $0x30] sm:$0xff]  ;;  %v1199_v63 = vld [vmem:[#allocation9 + $0x40] sm:$0xff] }
 0x764   :  { %v3088_v19 = vpack.c.bf16 %v1201_v39, %v1199_v63 }
 0x765   :  { %2502 = vtanh.f32 %v940_v11  ;;  %v1174_v36 = vrot.slane %v940_v11, 6  ;;  %v1321_v11 = vld [vmem:[#allocation8 + $0x48] sm:$0xff]  ;;  %2315 = vmatprep.subr.bf16.mxu1 %v3044_v41 }
 0x76f   :  { %v2503_v5 = vpop.eup %2502 }
 0x770   :  { %v942_v51 = vmul.f32 %v2503_v5, %v930_v54  ;;  %v3052_v54 = vpack.c.bf16 %v1318_v46, %v1316_v27  ;;  %v3055_v5 = vpack.c.bf16 %v1323_v50, %v1321_v11  ;;  %v1203_v46 = vld [vmem:[#allocation9 + $0x60] sm:$0xff]  ;;  %v1205_v11 = vld [vmem:[#allocation9 + $0x70] sm:$0xff] }
 0x771   :  { %v3095_v50 = vpack.c.bf16 %v1205_v11, %v1203_v46  ;;  %v1454_v46 = vld [vmem:[#allocation9 + $0x98] sm:$0xff]  ;;  %v1451_v11 = vld [vmem:[#allocation9 + $0x80] sm:$0xff] }
 0x772   :  { %v1087_v21 = vrot.slane %v942_v51, 6 }
 0x774   :  { %1088 = vrot.lane.b32.xlu1 %v1087_v21, %s2671_s3  ;;  %v1322_v21 = vld [vmem:[#allocation8 + $0x50] sm:$0xff] }
 0x778   :  { %944 = vrot.lane.b32.xlu1 %v942_v51, %s2671_s3  ;;  %v1320_v51 = vld [vmem:[#allocation8 + $0x40] sm:$0xff] }
 0x7d4   :  { %v800_v6 = vpop.f32.mrb[10].mxu0 }
 0x7d5   :  { %v801_v18 = vadd.f32 %v800_v6, %v2897_v32  ;;  %v802_v20 = vpop.f32.mrb[11].mxu0  ;;  %v1325_v6 = vld [vmem:[#allocation8 + $0x68] sm:$0xff] }
 0x7d6   :  { %v803_v25 = vadd.f32 %v802_v20, %v2901_v33  ;;  %v3058_v20 = vpack.c.bf16 %v1322_v21, %v1320_v51 }
 0x7d7   :  { %v805_v26 = vmul.f32 0.5, %v801_v18  ;;  %v1327_v18 = vld [vmem:[#allocation8 + $0x78] sm:$0xff] }
 0x7d8   :  { %v806_v29 = vmul.f32 0.5, %v803_v25  ;;  %v3061_v25 = vpack.c.bf16 %v1327_v18, %v1325_v6 }
 0x7d9   :  { %2504 = vtanh.f32 %v805_v26  ;;  %v1324_v26 = vld [vmem:[#allocation8 + $0x60] sm:$0xff] }
 0x7da   :  { %2506 = vtanh.f32 %v806_v29  ;;  %v1326_v29 = vld [vmem:[#allocation8 + $0x70] sm:$0xff] }
 0x7e3   :  { %v2505_v10 = vpop.eup %2504 }
 0x7e4   :  { %v809_v30 = vmul.f32 0.5, %v2505_v10  ;;  %v2507_v40 = vpop.eup %2506  ;;  %v3064_v10 = vpack.c.bf16 %v1326_v29, %v1324_v26 }
 0x7e5   :  { %v811_v13 = vmul.f32 0.5, %v2507_v40 }
 0x7e6   :  { %v810_v34 = vadd.f32 0.5, %v809_v30  ;;  %v1089_v35 = vpop.permute.xlu1 %1088 }
 0x7e7   :  { %2095 = vmatmul.mubr.msk.f32.vlgmr.msra.gmra.mrb[12].mxu0 %vm239_vm2, %v1089_v35  ;;  %v812_v52 = vadd.f32 0.5, %v811_v13  ;;  %v1192_v35 = vld [vmem:[#allocation9 + $0x8] sm:$0xff] }
 0x7e8   :  { %v814_v42 = vmul.f32 %v2507_v40, %v810_v34  ;;  %1287 = vmatprep.mubr.f32.mxu0 %v2670_v1  ;;  %v813_v47 = vmul.f32 %v810_v34, %v571_v24  ;;  %v1194_v40 = vld [vmem:[#allocation9 + $0x18] sm:$0xff]  ;;  %v1196_v13 = vld [vmem:[#allocation9 + $0x28] sm:$0xff] }
 0x7ea   :  { %816 = vrot.lane.b32.xlu0 %v814_v42, %s2671_s3  ;;  %v945_v59 = vpop.permute.xlu1 %944  ;;  %v1191_v42 = vld [vmem:[#allocation9] sm:$0xff] }
 0x85c   :  { %v817_v48 = vpop.permute.xlu0 %816 }
 0x85d   :  { %v3027_v53 = vadd.f32 %v817_v48, %v813_v47  ;;  %v3071_v47 = vpack.c.bf16 %v1194_v40, %v1192_v35  ;;  %v1193_v48 = vld [vmem:[#allocation9 + $0x10] sm:$0xff] }
 0x85f   :  { %2508 = vtanh.f32 %v3027_v53  ;;  %2283 = vmatprep.subr.bf16.mxu0 %v3071_v47 }
 0x869   :  { %v2509_v55 = vpop.eup %2508 }
 0x86a   :  { %v821_v56 = vmul.f32 %v2509_v55, %v812_v52  ;;  %v1198_v52 = vld [vmem:[#allocation9 + $0x38] sm:$0xff]  ;;  %v3073_v55 = vpack.c.bf16 %v1193_v48, %v1191_v42 }
 0x86c   :  { %822 = vst.msk [vmem:[#allocation2] sm:$0x3] %vm330_vm3, %v821_v56  ;;  %v3075_v56 = vpack.c.bf16 %v1198_v52, %v1196_v13  ;;  %2285 = vmatpush1.bf16.msra.mxu0 %v3073_v55 }
 0x86d   :  { %948 = vst.msk [vmem:[#allocation2 - $0x6] sm:$0xc0] %vm947_vm6, %v945_v59  ;;  %v1195_v59 = vld [vmem:[#allocation9 + $0x20] sm:$0xff] }
 0x86e   :  { %2287 = vmatprep.subr.bf16.mxu0 %v3075_v56 }
 0x874   :  { %v949_v60 = vld [vmem:[#allocation2] sm:$0x3] }
 0x875   :  { %1047 = vmatmul.mubr.f32.vlgmr.msra.gmra.mrb[4].mxu1 %v949_v60  ;;  %v1197_v60 = vld [vmem:[#allocation9 + $0x30] sm:$0xff] }
 0x876   :  { %1394 = vmatprep.mubr.f32.mxu1 %v2670_v1  ;;  %2317 = vmatpush1.bf16.msra.mxu1 %v3046_v8 }
 0x877   :  { %2319 = vmatprep.subr.bf16.mxu1 %v3048_v49 }
 0x87a   :  { %2321 = vmatpush1.bf16.msra.mxu1 %v3052_v54 }
 0x87b   :  { %2323 = vmatprep.subr.bf16.mxu1 %v3055_v5 }
 0x87e   :  { %2325 = vmatpush1.bf16.msra.mxu1 %v3058_v20 }
 0x87f   :  { %2327 = vmatprep.subr.bf16.mxu1 %v3061_v25 }
 0x882   :  { %2329 = vmatpush1.bf16.msra.mxu1 %v3064_v10 }
 0x883   :  { %2331 = vmatprep.subr.bf16.mxu1 %v3071_v47 }
 0x8ba   :  { %v1158_v4 = vpop.f32.mrb[12].mxu0 }
 0x8bb   :  { %v1163_v7 = vadd.f32 %v1158_v4, %v3035_v0  ;;  %v1160_v12 = vpop.f32.mrb[13].mxu0 }
 0x8bc   :  { %v1164_v16 = vadd.f32 %v1160_v12, %v3039_v2 }
 0x8bd   :  { %v1165_v22 = vmul.f32 0.5, %v1163_v7 }
 0x8be   :  { %v1166_v23 = vmul.f32 0.5, %v1164_v16  ;;  %v3081_v16 = vpack.c.bf16 %v1197_v60, %v1195_v59 }
 0x8bf   :  { %2510 = vtanh.f32 %v1165_v22 }
 0x8c0   :  { %2512 = vtanh.f32 %v1166_v23  ;;  %2289 = vmatpush1.bf16.msra.mxu0 %v3081_v16 }
 0x8c9   :  { %v2511_v24 = vpop.eup %2510 }
 0x8ca   :  { %v1169_v28 = vmul.f32 0.5, %v2511_v24  ;;  %v2513_v14 = vpop.eup %2512 }
 0x8cb   :  { %v1171_v23 = vmul.f32 0.5, %v2513_v14 }
 0x8cc   :  { %v1170_v37 = vadd.f32 0.5, %v1169_v28 }
 0x8ce   :  { %v1177_v62 = vmul.f32 %v2513_v14, %v1170_v37  ;;  %v1176_v38 = vmul.f32 %v1174_v36, %v1170_v37  ;;  %v1172_v36 = vadd.f32 0.5, %v1171_v23  ;;  %v1200_v37 = vld [vmem:[#allocation9 + $0x48] sm:$0xff] }
 0x8cf   :  { %v1204_v14 = vld [vmem:[#allocation9 + $0x68] sm:$0xff] }
 0x8d0   :  { %1179 = vrot.lane.b32.xlu0 %v1177_v62, %s2671_s3  ;;  %v1202_v62 = vld [vmem:[#allocation9 + $0x58] sm:$0xff]  ;;  %v3093_v27 = vpack.c.bf16 %v1206_v44, %v1204_v14  ;;  %v1452_v44 = vld [vmem:[#allocation9 + $0x88] sm:$0xff] }
 0x8d1   :  { %v3086_v15 = vpack.c.bf16 %v1202_v62, %v1200_v37 }
 0x8d3   :  { %2291 = vmatprep.subr.bf16.mxu0 %v3086_v15 }
 0x8d4   :  { %2293 = vmatpush1.bf16.msra.mxu0 %v3088_v19 }
 0x8d5   :  { %2295 = vmatprep.subr.bf16.mxu0 %v3093_v27 }
 0x8d8   :  { %2297 = vmatpush1.bf16.msra.mxu0 %v3095_v50 }
 0x8d9   :  { %2299 = vmatprep.subr.bf16.mxu0 %v2930_v43 }
 0x8dc   :  { %2301 = vmatpush1.bf16.msra.mxu0 %v2932_v45 }
 0x8dd   :  { %2303 = vmatprep.subr.bf16.mxu0 %v2940_v58 }
 0x8e0   :  { %2305 = vmatpush1.bf16.msra.mxu0 %v2942_v61 }
 0x8e1   :  { %2307 = vmatprep.subr.bf16.mxu0 %v2948_v3 }
 0x8e4   :  { %2309 = vmatpush1.bf16.msra.mxu0 %v2950_v9 }
 0x8e5   :  { %2311 = vmatprep.subr.bf16.mxu0 %v2956_v57 }
 0x8e8   :  { %2313 = vmatpush1.bf16.msra.mxu0 %v2958_v31 }
 0x8e9   :  { %2363 = vmatprep.subr.bf16.mxu0 %v3044_v41 }
 0x942   :  { %v1180_v30 = vpop.permute.xlu0 %1179 }
 0x943   :  { %v3068_v34 = vadd.f32 %v1180_v30, %v1176_v38 }
 0x945   :  { %2514 = vtanh.f32 %v3068_v34 }
 0x948   :  { %v1048_v4 = vpop.f32.mrb[4].mxu1 }
 0x949   :  { %v1049_v7 = vadd.f32 %v1048_v4, %v2897_v32  ;;  %v1050_v12 = vpop.f32.mrb[5].mxu1  ;;  %v1418_v4 = vrot.slane %v3068_v34, 6 }
 0x94a   :  { %v1051_v22 = vadd.f32 %v1050_v12, %v2901_v33 }
 0x94b   :  { %v1053_v24 = vmul.f32 0.5, %v1049_v7 }
 0x94c   :  { %v1054_v28 = vmul.f32 0.5, %v1051_v22 }
 0x94d   :  { %2516 = vtanh.f32 %v1053_v24 }
 0x94e   :  { %2518 = vtanh.f32 %v1054_v28 }
 0x94f   :  { %v2515_v38 = vpop.eup %2514 }
 0x950   :  { %v1184_v17 = vmul.f32 %v2515_v38, %v1172_v36 }
 0x952   :  { %1186 = vrot.lane.b32.xlu1 %v1184_v17, %s2671_s3 }
 0x957   :  { %v2517_v51 = vpop.eup %2516 }
 0x958   :  { %v1057_v21 = vmul.f32 0.5, %v2517_v51  ;;  %v2519_v18 = vpop.eup %2518  ;;  %v3140_v51 = vpack.c.bf16 %v1454_v46, %v1452_v44 }
 0x959   :  { %v1059_v3 = vmul.f32 0.5, %v2519_v18 }
 0x95a   :  { %v1058_v6 = vadd.f32 0.5, %v1057_v21  ;;  %v1453_v21 = vld [vmem:[#allocation9 + $0x90] sm:$0xff] }
 0x95b   :  { %v1060_v9 = vadd.f32 0.5, %v1059_v3  ;;  %v1455_v3 = vld [vmem:[#allocation9 + $0xa0] sm:$0xff] }
 0x95c   :  { %v1062_v26 = vmul.f32 %v2519_v18, %v1058_v6  ;;  %v1061_v45 = vmul.f32 %v1058_v6, %v3027_v53  ;;  %v3142_v6 = vpack.c.bf16 %v1453_v21, %v1451_v11 }
 0x95e   :  { %1064 = vrot.lane.b32.xlu0 %v1062_v26, %s2671_s3 }
 0x9c4   :  { %v1187_v43 = vpop.permute.xlu1 %1186 }
 0x9c5   :  { %2096 = vmatmul.mubr.msk.f32.vlgmr.msra.gmra.mrb[6].mxu1 %vm239_vm2, %v1187_v43 }
 0x9c6   :  { %2333 = vmatpush1.bf16.msra.mxu1 %v3073_v55  ;;  %1531 = vmatprep.mubr.f32.mxu1 %v2670_v1 }
 0x9c7   :  { %2335 = vmatprep.subr.bf16.mxu1 %v3075_v56 }
 0x9ca   :  { %2337 = vmatpush1.bf16.msra.mxu1 %v3081_v16 }
 0x9cb   :  { %2339 = vmatprep.subr.bf16.mxu1 %v3086_v15 }
 0x9ce   :  { %2341 = vmatpush1.bf16.msra.mxu1 %v3088_v19 }
 0x9cf   :  { %2343 = vmatprep.subr.bf16.mxu1 %v3093_v27 }
 0x9d0   :  { %v1065_v58 = vpop.permute.xlu0 %1064 }
 0x9d1   :  { %v3118_v61 = vadd.f32 %v1065_v58, %v1061_v45  ;;  %v1458_v45 = vld [vmem:[#allocation9 + $0xb8] sm:$0xff] }
 0x9d2   :  { %2345 = vmatpush1.bf16.msra.mxu1 %v3095_v50 }
 0x9d3   :  { %2520 = vtanh.f32 %v3118_v61  ;;  %2347 = vmatprep.subr.bf16.mxu1 %v3140_v51 }
 0x9d6   :  { %2349 = vmatpush1.bf16.msra.mxu1 %v3142_v6 }
 0x9dd   :  { %v2521_v57 = vpop.eup %2520 }
 0x9de   :  { %v1069_v31 = vmul.f32 %v2521_v57, %v1060_v9  ;;  %v1457_v9 = vld [vmem:[#allocation9 + $0xb0] sm:$0xff] }
 0x9df   :  { %v3151_v57 = vpack.c.bf16 %v1457_v9, %v1455_v3 }
 0x9e0   :  { %1070 = vst.msk [vmem:[#allocation2] sm:$0x3] %vm330_vm3, %v1069_v31  ;;  %v1460_v31 = vld [vmem:[#allocation9 + $0xc8] sm:$0xff] }
 0x9e1   :  { %1189 = vst.msk [vmem:[#allocation2] sm:$0x3] %vm221_vm1, %v1187_v43  ;;  %v1456_v43 = vld [vmem:[#allocation9 + $0xa8] sm:$0xff] }
 0x9e2   :  { %v3149_v58 = vpack.c.bf16 %v1458_v45, %v1456_v43 }
 0x9e4   :  { %2351 = vmatprep.subr.bf16.mxu1 %v3149_v58 }
 0x9e5   :  { %2353 = vmatpush1.bf16.msra.mxu1 %v3151_v57 }
 0x9e8   :  { %v1190_v29 = vld [vmem:[#allocation2] sm:$0x3] }
 0x9e9   :  { %1288 = vmatmul.mubr.f32.vlgmr.msra.gmra.mrb[14].mxu0 %v1190_v29  ;;  %v1462_v29 = vld [vmem:[#allocation9 + $0xd8] sm:$0xff] }
 0x9ea   :  { %2365 = vmatpush1.bf16.msra.mxu0 %v3046_v8  ;;  %1641 = vmatprep.mubr.f32.mxu0 %v2670_v1 }
 0x9eb   :  { %2367 = vmatprep.subr.bf16.mxu0 %v3048_v49 }
 0x9ee   :  { %2369 = vmatpush1.bf16.msra.mxu0 %v3052_v54 }
 0x9ef   :  { %2371 = vmatprep.subr.bf16.mxu0 %v3055_v5 }
 0x9f2   :  { %2373 = vmatpush1.bf16.msra.mxu0 %v3058_v20 }
 0x9f3   :  { %2375 = vmatprep.subr.bf16.mxu0 %v3061_v25 }
 0x9f6   :  { %2377 = vmatpush1.bf16.msra.mxu0 %v3064_v10 }
 0x9f7   :  { %2379 = vmatprep.subr.bf16.mxu0 %v3071_v47 }
 0xa98   :  { %v1396_v53 = vpop.f32.mrb[6].mxu1 }
 0xa99   :  { %v1403_v30 = vrot.slane %v1396_v53, 6  ;;  %v1398_v35 = vpop.f32.mrb[7].mxu1  ;;  %v3155_v53 = vpack.c.bf16 %v1462_v29, %v1460_v31 }
 0xa9a   :  { %v1404_v40 = vrot.slane %v1398_v35, 6  ;;  %v1461_v35 = vld [vmem:[#allocation9 + $0xd0] sm:$0xff] }
 0xa9b   :  { %v1407_v42 = vadd.f32 %v1403_v30, %v3035_v0  ;;  %v1459_v30 = vld [vmem:[#allocation9 + $0xc0] sm:$0xff]  ;;  %2355 = vmatprep.subr.bf16.mxu1 %v3155_v53 }
 0xa9c   :  { %v1408_v48 = vadd.f32 %v1404_v40, %v3039_v2 }
 0xa9d   :  { %v1409_v13 = vmul.f32 0.5, %v1407_v42  ;;  %v3157_v42 = vpack.c.bf16 %v1461_v35, %v1459_v30 }
 0xa9e   :  { %v1410_v52 = vmul.f32 0.5, %v1408_v48  ;;  %v1464_v48 = vld [vmem:[#allocation9 + $0xe8] sm:$0xff] }
 0xa9f   :  { %2522 = vtanh.f32 %v1409_v13  ;;  %v1466_v13 = vld [vmem:[#allocation9 + $0xf8] sm:$0xff]  ;;  %2357 = vmatpush1.bf16.msra.mxu1 %v3157_v42 }
 0xaa0   :  { %2524 = vtanh.f32 %v1410_v52  ;;  %v1463_v52 = vld [vmem:[#allocation9 + $0xe0] sm:$0xff] }
 0xaa9   :  { %v2523_v59 = vpop.eup %2522 }
 0xaaa   :  { %v1413_v60 = vmul.f32 0.5, %v2523_v59  ;;  %v2525_v12 = vpop.eup %2524  ;;  %v3161_v59 = vpack.c.bf16 %v1466_v13, %v1464_v48 }
 0xaab   :  { %v1415_v40 = vmul.f32 0.5, %v2525_v12 }
 0xaac   :  { %v1414_v7 = vadd.f32 0.5, %v1413_v60  ;;  %v1465_v60 = vld [vmem:[#allocation9 + $0xf0] sm:$0xff]  ;;  %2359 = vmatprep.subr.bf16.mxu1 %v3161_v59 }
 0xaae   :  { %v1421_v22 = vmul.f32 %v2525_v12, %v1414_v7  ;;  %v1420_v23 = vmul.f32 %v1418_v4, %v1414_v7  ;;  %v3163_v4 = vpack.c.bf16 %v1465_v60, %v1463_v52  ;;  %v1416_v7 = vadd.f32 0.5, %v1415_v40 }
 0xab0   :  { %1423 = vrot.lane.b32.xlu1 %v1421_v22, %s2671_s3  ;;  %2361 = vmatpush1.bf16.msra.mxu1 %v3163_v4 }
 0xab1   :  { %2411 = vmatprep.subr.bf16.mxu1 %v3044_v41 }
 0xabc   :  { %v1289_v24 = vpop.f32.mrb[14].mxu0 }
 0xabd   :  { %v1290_v28 = vadd.f32 %v1289_v24, %v2897_v32  ;;  %v1291_v36 = vpop.f32.mrb[15].mxu0 }
 0xabe   :  { %v1292_v37 = vadd.f32 %v1291_v36, %v2901_v33 }
 0xabf   :  { %v1294_v62 = vmul.f32 0.5, %v1290_v28 }
 0xac0   :  { %v1295_v38 = vmul.f32 0.5, %v1292_v37 }
 0xac1   :  { %2526 = vtanh.f32 %v1294_v62 }
 0xac2   :  { %2528 = vtanh.f32 %v1295_v38 }
 0xacb   :  { %v2527_v63 = vpop.eup %2526 }
 0xacc   :  { %v1298_v39 = vmul.f32 0.5, %v2527_v63  ;;  %v2529_v34 = vpop.eup %2528 }
 0xacd   :  { %v1300_v37 = vmul.f32 0.5, %v2529_v34 }
 0xace   :  { %v1299_v17 = vadd.f32 0.5, %v1298_v39 }
 0xacf   :  { %v1301_v62 = vadd.f32 0.5, %v1300_v37 }
 0xad0   :  { %v1303_v14 = vmul.f32 %v2529_v34, %v1299_v17  ;;  %v1302_v24 = vmul.f32 %v1299_v17, %v3118_v61 }
 0xad2   :  { %1305 = vrot.lane.b32.xlu1 %v1303_v14, %s2671_s3 }
 0xb22   :  { %v1424_v18 = vpop.permute.xlu1 %1423 }
 0xb23   :  { %v3146_v26 = vadd.f32 %v1424_v18, %v1420_v23 }
 0xb25   :  { %2530 = vtanh.f32 %v3146_v26  ;;  %v1665_v43 = vrot.slane %v3146_v26, 6 }
 0xb2f   :  { %v2531_v22 = vpop.eup %2530 }
 0xb30   :  { %v1428_v23 = vmul.f32 %v2531_v22, %v1416_v7 }
 0xb32   :  { %v1572_v12 = vrot.slane %v1428_v23, 2 }
 0xb34   :  { %1573 = vrot.lane.b32.xlu0 %v1572_v12, %s2671_s3 }
 0xb38   :  { %1430 = vrot.lane.b32.xlu0 %v1428_v23, %s2671_s3 }
 0xb44   :  { %v1306_v28 = vpop.permute.xlu1 %1305 }
 0xb45   :  { %v3171_v36 = vadd.f32 %v1306_v28, %v1302_v24 }
 0xb47   :  { %2532 = vtanh.f32 %v3171_v36 }
 0xb51   :  { %v2533_v38 = vpop.eup %2532 }
 0xb52   :  { %v1310_v63 = vmul.f32 %v2533_v38, %v1301_v62 }
 0xb54   :  { %1311 = vst.msk [vmem:[#allocation2] sm:$0x3] %vm330_vm3, %v1310_v63 }
 0xba6   :  { %v1574_v39 = vpop.permute.xlu0 %1573 }
 0xba7   :  { %2097 = vmatmul.mubr.msk.f32.vlgmr.msra.gmra.mrb[16].mxu0 %vm239_vm2, %v1574_v39 }
 0xba8   :  { %2381 = vmatpush1.bf16.msra.mxu0 %v3073_v55  ;;  %1778 = vmatprep.mubr.f32.mxu0 %v2670_v1 }
 0xba9   :  { %2383 = vmatprep.subr.bf16.mxu0 %v3075_v56 }
 0xbaa   :  { %v1431_v41 = vpop.permute.xlu0 %1430 }
 0xbab   :  { %1433 = vst.msk [vmem:[#allocation2 - $0x2] sm:$0xc] %vm451_vm4, %v1431_v41 }
 0xbac   :  { %2385 = vmatpush1.bf16.msra.mxu0 %v3081_v16 }
 0xbad   :  { %2387 = vmatprep.subr.bf16.mxu0 %v3086_v15 }
 0xbb0   :  { %2389 = vmatpush1.bf16.msra.mxu0 %v3088_v19 }
 0xbb1   :  { %2391 = vmatprep.subr.bf16.mxu0 %v3093_v27 }
 0xbb2   :  { %v1434_v61 = vld [vmem:[#allocation2] sm:$0x3] }
 0xbb3   :  { %1532 = vmatmul.mubr.f32.vlgmr.msra.gmra.mrb[8].mxu1 %v1434_v61 }
 0xbb4   :  { %2413 = vmatpush1.bf16.msra.mxu1 %v3046_v8  ;;  %2393 = vmatpush1.bf16.msra.mxu0 %v3095_v50 }
 0xbb5   :  { %2415 = vmatprep.subr.bf16.mxu1 %v3048_v49  ;;  %2395 = vmatprep.subr.bf16.mxu0 %v3140_v51 }
 0xbb6   :  { %1888 = vmatprep.mubr.f32.mxu1 %v2670_v1 }
 0xbb8   :  { %2417 = vmatpush1.bf16.msra.mxu1 %v3052_v54  ;;  %2397 = vmatpush1.bf16.msra.mxu0 %v3142_v6 }
 0xbb9   :  { %2419 = vmatprep.subr.bf16.mxu1 %v3055_v5  ;;  %2399 = vmatprep.subr.bf16.mxu0 %v3149_v58 }
 0xbbc   :  { %2421 = vmatpush1.bf16.msra.mxu1 %v3058_v20  ;;  %2401 = vmatpush1.bf16.msra.mxu0 %v3151_v57 }
 0xbbd   :  { %2423 = vmatprep.subr.bf16.mxu1 %v3061_v25  ;;  %2403 = vmatprep.subr.bf16.mxu0 %v3155_v53 }
 0xbc0   :  { %2425 = vmatpush1.bf16.msra.mxu1 %v3064_v10  ;;  %2405 = vmatpush1.bf16.msra.mxu0 %v3157_v42 }
 0xbc1   :  { %2407 = vmatprep.subr.bf16.mxu0 %v3161_v59  ;;  %2427 = vmatprep.subr.bf16.mxu1 %v3071_v47 }
 0xbc4   :  { %2409 = vmatpush1.bf16.msra.mxu0 %v3163_v4 }
 0xc7a   :  { %v1643_v8 = vpop.f32.mrb[16].mxu0 }
 0xc7b   :  { %v1650_v49 = vrot.slane %v1643_v8, 4  ;;  %v1645_v54 = vpop.f32.mrb[17].mxu0 }
 0xc7c   :  { %v1651_v5 = vrot.slane %v1645_v54, 4 }
 0xc7d   :  { %v1654_v20 = vadd.f32 %v1650_v49, %v3035_v0 }
 0xc7e   :  { %v1655_v25 = vadd.f32 %v1651_v5, %v3039_v2 }
 0xc7f   :  { %v1656_v17 = vmul.f32 0.5, %v1654_v20 }
 0xc80   :  { %v1657_v34 = vmul.f32 0.5, %v1655_v25 }
 0xc81   :  { %2534 = vtanh.f32 %v1656_v17 }
 0xc82   :  { %2536 = vtanh.f32 %v1657_v34 }
 0xc86   :  { %v1533_v10 = vpop.f32.mrb[8].mxu1 }
 0xc87   :  { %v1534_v14 = vadd.f32 %v1533_v10, %v2897_v32  ;;  %v1535_v44 = vpop.f32.mrb[9].mxu1 }
 0xc88   :  { %v1536_v47 = vadd.f32 %v1535_v44, %v2901_v33 }
 0xc89   :  { %v1538_v46 = vmul.f32 0.5, %v1534_v14 }
 0xc8a   :  { %v1539_v21 = vmul.f32 0.5, %v1536_v47 }
 0xc8b   :  { %v2535_v11 = vpop.eup %2534  ;;  %2538 = vtanh.f32 %v1538_v46 }
 0xc8c   :  { %v1660_v18 = vmul.f32 0.5, %v2535_v11  ;;  %v2537_v3 = vpop.eup %2536  ;;  %2540 = vtanh.f32 %v1539_v21 }
 0xc8d   :  { %v1662_v26 = vmul.f32 0.5, %v2537_v3 }
 0xc8e   :  { %v1661_v45 = vadd.f32 0.5, %v1660_v18 }
 0xc8f   :  { %v1663_v23 = vadd.f32 0.5, %v1662_v26 }
 0xc90   :  { %v1668_v9 = vmul.f32 %v2537_v3, %v1661_v45  ;;  %v1667_v31 = vmul.f32 %v1665_v43, %v1661_v45 }
 0xc92   :  { %1670 = vrot.lane.b32.xlu1 %v1668_v9, %s2671_s3 }
 0xc95   :  { %v2539_v29 = vpop.eup %2538 }
 0xc96   :  { %v1542_v30 = vmul.f32 0.5, %v2539_v29  ;;  %v2541_v40 = vpop.eup %2540 }
 0xc97   :  { %v1544_v37 = vmul.f32 0.5, %v2541_v40 }
 0xc98   :  { %v1543_v35 = vadd.f32 0.5, %v1542_v30  ;;  %v2099_v30 = vld [vmem:[%s3266_s6] ss:$0 sm:$0xff] }
 0xc99   :  { %v1545_v62 = vadd.f32 0.5, %v1544_v37 }
 0xc9a   :  { %v1547_v48 = vmul.f32 %v2541_v40, %v1543_v35  ;;  %v1546_v60 = vmul.f32 %v1543_v35, %v3171_v36 }
 0xc9c   :  { %1549 = vrot.lane.b32.xlu1 %v1547_v48, %s2671_s3 }
 0xd04   :  { %v1671_v13 = vpop.permute.xlu1 %1670 }
 0xd05   :  { %v3209_v52 = vadd.f32 %v1671_v13, %v1667_v31 }
 0xd07   :  { %2542 = vtanh.f32 %v3209_v52  ;;  %v1912_v61 = vrot.slane %v3209_v52, 6 }
 0xd0e   :  { %v1550_v7 = vpop.permute.xlu1 %1549 }
 0xd0f   :  { %v3213_v22 = vadd.f32 %v1550_v7, %v1546_v60 }
 0xd11   :  { %v2543_v12 = vpop.eup %2542  ;;  %2544 = vtanh.f32 %v3213_v22 }
 0xd12   :  { %v1675_v24 = vmul.f32 %v2543_v12, %v1663_v23 }
 0xd14   :  { %v1819_v28 = vrot.slane %v1675_v24, 4 }
 0xd16   :  { %1820 = vrot.lane.b32.xlu0 %v1819_v28, %s2671_s3 }
 0xd1a   :  { %1677 = vrot.lane.b32.xlu0 %v1675_v24, %s2671_s3 }
 0xd1b   :  { %v2545_v38 = vpop.eup %2544 }
 0xd1c   :  { %v1554_v63 = vmul.f32 %v2545_v38, %v1545_v62 }
 0xd1e   :  { %1555 = vst.msk [vmem:[#allocation2] sm:$0x3] %vm330_vm3, %v1554_v63 }
 0xd88   :  { %v1821_v36 = vpop.permute.xlu0 %1820 }
 0xd89   :  { %2098 = vmatmul.mubr.msk.f32.vlgmr.msra.gmra.mrb[10].mxu1 %vm239_vm2, %v1821_v36 }
 0xd8a   :  { %2429 = vmatpush1.bf16.msra.mxu1 %v3073_v55  ;;  %2025 = vmatprep.mubr.f32.mxu1 %v2670_v1 }
 0xd8b   :  { %2431 = vmatprep.subr.bf16.mxu1 %v3075_v56 }
 0xd8c   :  { %v1678_v39 = vpop.permute.xlu0 %1677 }
 0xd8d   :  { %1680 = vst.msk [vmem:[#allocation2 - $0x4] sm:$0x30] %vm699_vm5, %v1678_v39 }
 0xd8e   :  { %2433 = vmatpush1.bf16.msra.mxu1 %v3081_v16 }
 0xd8f   :  { %2435 = vmatprep.subr.bf16.mxu1 %v3086_v15 }
 0xd92   :  { %2437 = vmatpush1.bf16.msra.mxu1 %v3088_v19 }
 0xd93   :  { %2439 = vmatprep.subr.bf16.mxu1 %v3093_v27 }
 0xd94   :  { %v1681_v41 = vld [vmem:[#allocation2] sm:$0x3] }
 0xd95   :  { %1779 = vmatmul.mubr.f32.vlgmr.msra.gmra.mrb[18].mxu0 %v1681_v41 }
 0xd96   :  { %2441 = vmatpush1.bf16.msra.mxu1 %v3095_v50 }
 0xd97   :  { %2443 = vmatprep.subr.bf16.mxu1 %v3140_v51 }
 0xd9a   :  { %2445 = vmatpush1.bf16.msra.mxu1 %v3142_v6 }
 0xd9b   :  { %2447 = vmatprep.subr.bf16.mxu1 %v3149_v58 }
 0xd9e   :  { %2449 = vmatpush1.bf16.msra.mxu1 %v3151_v57 }
 0xd9f   :  { %2451 = vmatprep.subr.bf16.mxu1 %v3155_v53 }
 0xda2   :  { %2453 = vmatpush1.bf16.msra.mxu1 %v3157_v42 }
 0xda3   :  { %2455 = vmatprep.subr.bf16.mxu1 %v3161_v59 }
 0xda6   :  { %2457 = vmatpush1.bf16.msra.mxu1 %v3163_v4 }
 0xe5c   :  { %v1890_v1 = vpop.f32.mrb[10].mxu1 }
 0xe5d   :  { %v1897_v55 = vrot.slane %v1890_v1, 2  ;;  %v1892_v56 = vpop.f32.mrb[11].mxu1  ;;  %v2100_v1 = vld [vmem:[#allocation3] ss:$0 sm:$0xff] }
 0xe5e   :  { %v1898_v16 = vrot.slane %v1892_v56, 2 }
 0xe5f   :  { %v1901_v15 = vadd.f32 %v1897_v55, %v3035_v0 }
 0xe60   :  { %v1902_v19 = vadd.f32 %v1898_v16, %v3039_v2 }
 0xe61   :  { %v1903_v27 = vmul.f32 0.5, %v1901_v15 }
 0xe62   :  { %v1904_v50 = vmul.f32 0.5, %v1902_v19 }
 0xe63   :  { %2546 = vtanh.f32 %v1903_v27 }
 0xe64   :  { %2548 = vtanh.f32 %v1904_v50 }
 0xe68   :  { %v1780_v51 = vpop.f32.mrb[18].mxu0 }
 0xe69   :  { %v1781_v6 = vadd.f32 %v1780_v51, %v2897_v32  ;;  %v1782_v58 = vpop.f32.mrb[19].mxu0 }
 0xe6a   :  { %v1783_v57 = vadd.f32 %v1782_v58, %v2901_v33 }
 0xe6b   :  { %v1785_v53 = vmul.f32 0.5, %v1781_v6 }
 0xe6c   :  { %v1786_v59 = vmul.f32 0.5, %v1783_v57 }
 0xe6d   :  { %v2547_v42 = vpop.eup %2546  ;;  %2550 = vtanh.f32 %v1785_v53 }
 0xe6e   :  { %v1907_v4 = vmul.f32 0.5, %v2547_v42  ;;  %v2549_v8 = vpop.eup %2548  ;;  %2552 = vtanh.f32 %v1786_v59 }
 0xe6f   :  { %v1909_v14 = vmul.f32 0.5, %v2549_v8 }
 0xe70   :  { %v1908_v0 = vadd.f32 0.5, %v1907_v4 }
 0xe71   :  { %v1910_v11 = vadd.f32 0.5, %v1909_v14 }
 0xe72   :  { %v1915_v2 = vmul.f32 %v2549_v8, %v1908_v0  ;;  %v1914_v49 = vmul.f32 %v1912_v61, %v1908_v0 }
 0xe74   :  { %1917 = vrot.lane.b32.xlu1 %v1915_v2, %s2671_s3 }
 0xe77   :  { %v2551_v54 = vpop.eup %2550 }
 0xe78   :  { %v1789_v5 = vmul.f32 0.5, %v2551_v54  ;;  %v2553_v25 = vpop.eup %2552 }
 0xe79   :  { %v1791_v43 = vmul.f32 0.5, %v2553_v25 }
 0xe7a   :  { %v1790_v20 = vadd.f32 0.5, %v1789_v5 }
 0xe7b   :  { %v1792_v45 = vadd.f32 0.5, %v1791_v43 }
 0xe7c   :  { %v1794_v17 = vmul.f32 %v2553_v25, %v1790_v20  ;;  %v1793_v44 = vmul.f32 %v1790_v20, %v3213_v22 }
 0xe7e   :  { %1796 = vrot.lane.b32.xlu0 %v1794_v17, %s2671_s3 }
 0xee6   :  { %v1918_v34 = vpop.permute.xlu1 %1917 }
 0xee7   :  { %v1920_v10 = vadd.f32 %v1918_v34, %v1914_v49 }
 0xee9   :  { %2554 = vtanh.f32 %v1920_v10 }
 0xef0   :  { %v1797_v47 = vpop.permute.xlu0 %1796 }
 0xef1   :  { %v1799_v46 = vadd.f32 %v1797_v47, %v1793_v44 }
 0xef3   :  { %v2555_v21 = vpop.eup %2554  ;;  %2556 = vtanh.f32 %v1799_v46 }
 0xef4   :  { %v1922_v18 = vmul.f32 %v2555_v21, %v1910_v11 }
 0xef6   :  { %1924 = vrot.lane.b32.xlu1 %v1922_v18, %s2671_s3 }
 0xefa   :  { %2055 = vrot.lane.b32.xlu1 %v2099_v30, %s2671_s3 }
 0xefd   :  { %v2557_v3 = vpop.eup %2556 }
 0xefe   :  { %v1801_v9 = vmul.f32 %v2557_v3, %v1792_v45 }
 0xf00   :  { %1802 = vst.msk [vmem:[#allocation2] sm:$0x3] %vm330_vm3, %v1801_v9 }
 0xf68   :  { %v1925_v31 = vpop.permute.xlu1 %1924 }
 0xf69   :  { %1927 = vst.msk [vmem:[#allocation2 - $0x6] sm:$0xc0] %vm947_vm6, %v1925_v31 }
 0xf6c   :  { %v2056_v63 = vpop.permute.xlu1 %2055 }
 0xf70   :  { %v1928_v29 = vld [vmem:[#allocation2] sm:$0x3] }
 0xf71   :  { %2026 = vmatmul.mubr.f32.vlgmr.msra.gmra.mrb[12].mxu1 %v1928_v29 }
0x1044   :  { %v2027_v35 = vpop.f32.mrb[12].mxu1 }
0x1045   :  { %v2028_v40 = vadd.f32 %v2027_v35, %v2897_v32  ;;  %v2029_v48 = vpop.f32.mrb[13].mxu1 }
0x1046   :  { %v2030_v13 = vadd.f32 %v2029_v48, %v2901_v33 }
0x1047   :  { %v2032_v52 = vmul.f32 0.5, %v2028_v40 }
0x1048   :  { %v2033_v26 = vmul.f32 0.5, %v2030_v13 }
0x1049   :  { %2558 = vtanh.f32 %v2032_v52 }
0x104a   :  { %2560 = vtanh.f32 %v2033_v26 }
0x1053   :  { %v2559_v60 = vpop.eup %2558 }
0x1054   :  { %v2036_v7 = vmul.f32 0.5, %v2559_v60  ;;  %v2561_v23 = vpop.eup %2560 }
0x1055   :  { %v2038_v62 = vmul.f32 0.5, %v2561_v23 }
0x1056   :  { %v2037_v22 = vadd.f32 0.5, %v2036_v7 }
0x1057   :  { %v2039_v32 = vadd.f32 0.5, %v2038_v62 }
0x1058   :  { %v2041_v12 = vmul.f32 %v2561_v23, %v2037_v22  ;;  %v2040_v24 = vmul.f32 %v2037_v22, %v1799_v46 }
0x105a   :  { %2043 = vrot.lane.b32.xlu0 %v2041_v12, %s2671_s3 }
0x10cc   :  { %v2044_v28 = vpop.permute.xlu0 %2043 }
0x10cd   :  { %v2046_v37 = vadd.f32 %v2044_v28, %v2040_v24 }
0x10cf   :  { %2562 = vtanh.f32 %v2046_v37 }
0x10d9   :  { %v2563_v38 = vpop.eup %2562 }
0x10da   :  { %v2048_v33 = vmul.f32 %v2563_v38, %v2039_v32 }
0x10dc   :  { %v2058_v36 = vmul.f32 %v2056_v63, %v2048_v33 }
0x10de   :  { %2060 = vrot.lane.b32.xlu0 %v2058_v36, %s2671_s3 }
0x1150   :  { %v2061_v39 = vpop.permute.xlu0 %2060 }
0x1151   :  { %v2063_v41 = vsel %vm221_vm1, %v2061_v39, 0.0 }
0x1152   :  { %2064 = vadd.xlane.f32.xlu1 %v2063_v41 }
0x11df   :  { %v2065_v55 = vpop.xlane.xlu1 %2064 }
0x11e0   :  { %v2073_v56 = vadd.f32 %v2100_v1, %v2065_v55 }
0x11e2   :  { %v2101_v16 = vmul.f32 -1.442695, %v2073_v56 }
0x11e4   :  { %2564 = vpow2.f32 %v2101_v16 }
0x11ee   :  { %v2565_v15 = vpop.eup %2564 }
0x11ef   :  { %v2077_v19 = vadd.f32 1.0, %v2565_v15 }
0x11f1   :  { %2566 = vrcp.f32 %v2077_v19 }
0x11fb   :  { %v2567_v27 = vpop.eup %2566 }
0x11fc   :  { %2081 = vst.msk [vmem:[%s3268_s8] sm:$0x3] %vm2080_vm7, %v2567_v27 }
0x11fd   :  { %2086 = vsyncpa [#allocation5], 1 }
0x11fe   :  { %2087 = vsyncpa [#allocation7], 1 }
0x11ff   :  { %2088 = vsyncpa [#allocation10], 1 }

</bundles_post_ra>
